<compile_context>
chip_gen: v5e
topology: v5e:2x2
jax: 0.10.0
libtpu: 0.0.40
codegen_flags: <defaults>
</compile_context>

<pallas_src>
import functools

import jax
import jax.numpy as jnp
from jax.experimental import pallas as pl
from jax.experimental.pallas import tpu as pltpu


def _gt_focal_kernel(tgt_ref, w_ref, *refs, hw, num_classes, alpha, gamma, n_levels):
    """Fused per-tile kernel.

    refs layout:
      refs[:n_levels]                    -> level logits blocks, each (C, TP)
                                            (level 0 = `out`, 1..n_levels-1 = gt_pre)
      refs[n_levels : 2*n_levels + 1]    -> outputs: focal_sum, wnll[0..n_gt-1], wsum
                                            each (1, 1)
      refs[2*n_levels + 1 :]             -> scratch accumulators, each (1, TP)
    """
    n_out = n_levels + 1
    lev_refs = refs[:n_levels]
    out_refs = refs[n_levels:n_levels + n_out]
    acc_refs = refs[n_levels + n_out:]

    focal_out, wnll_outs, wsum_out = out_refs[0], out_refs[1:-1], out_refs[-1]
    focal_acc, wnll_accs, wsum_acc = acc_refs[0], acc_refs[1:-1], acc_refs[-1]

    t_idx = pl.program_id(1)
    last_t = pl.num_programs(1) - 1

    # Zero the resident accumulators at the start of every sample's tile loop.
    @pl.when(t_idx == 0)
    def _():
        for a in acc_refs:
            a[...] = jnp.zeros_like(a)

    tgt = tgt_ref[...]                                   # (1, TP) int32
    w = w_ref[...]                                       # (C, 1)  f32
    c = w.shape[0]
    tp = tgt.shape[1]

    # Mask for the (possibly partial) last pixel tile, plus the ignore_index mask.
    lane = jax.lax.broadcasted_iota(jnp.int32, (1, tp), 1)
    in_range = (t_idx * tp + lane) < hw                  # (1, TP) bool
    valid = jnp.logical_and(tgt != num_classes, in_range)
    t_safe = jnp.where(valid, tgt, 0)                    # (1, TP) int32

    # One-hot over classes (classes on sublanes, pixels on lanes). Computed once
    # per tile and reused by all 6 levels.
    row = jax.lax.broadcasted_iota(jnp.int32, (c, tp), 0)
    onehot = (row == t_safe).astype(jnp.float32)         # (C, TP)
    w_t = jnp.sum(onehot * w, axis=0, keepdims=True)     # (1, TP) gathered class weight

    def weighted_logpt(x_ref):
        """logpt_i = -CE_i = w[t_i] * log_softmax(x)_[t_i]; 0 where ignored / padded."""
        x = x_ref[...].astype(jnp.float32)               # (C, TP)
        m = jnp.max(x, axis=0, keepdims=True)            # sublane reduce
        z = x - m
        lse = jnp.log(jnp.sum(jnp.exp(z), axis=0, keepdims=True))
        lp_t = jnp.sum(onehot * z, axis=0, keepdims=True) - lse
        # jnp.where (not multiply) so garbage in padded lanes cannot leak NaN/Inf.
        return jnp.where(valid, w_t * lp_t, 0.0)         # (1, TP)

    # ---- Focal term on the main `out` logits (level 0) ----
    logpt = weighted_logpt(lev_refs[0])
    pt = jnp.exp(logpt)
    q = 1.0 - pt
    g = float(gamma)
    if g == 2.0:
        qg = q * q                                       # VPU mul, avoids EUP pow
    elif g == int(g):
        qg = jax.lax.integer_pow(q, int(g))
    else:
        qg = q ** g
    scaled = logpt if alpha is None else alpha * logpt
    focal_acc[...] += -qg * scaled

    # ---- Shared CE-mean denominator (sum of gathered weights over valid pixels) ----
    wsum_acc[...] += jnp.where(valid, w_t, 0.0)

    # ---- Weighted-NLL numerators for the gt_pre pyramid levels ----
    for k in range(1, n_levels):
        wnll_accs[k - 1][...] += -weighted_logpt(lev_refs[k])

    # ---- Single cross-lane reduction + scalar store on the final tile only ----
    @pl.when(t_idx == last_t)
    def _():
        focal_out[...] = jnp.sum(focal_acc[...], axis=1, keepdims=True)
        wsum_out[...] = jnp.sum(wsum_acc[...], axis=1, keepdims=True)
        for k in range(n_levels - 1):
            wnll_outs[k][...] = jnp.sum(wnll_accs[k][...], axis=1, keepdims=True)


def _fused_sums(levels, target, cls_weights, num_classes, alpha, gamma, tile_p):
    """Run the fused kernel.

    Returns a tuple of (N,1,1) f32 arrays:
      (focal_sum, wnll_sum[level 1], ..., wnll_sum[level n-1], weight_sum)
    """
    n, c, h, w = levels[0].shape
    hw = h * w
    nt, ht, wt = target.shape
    # TODO(synk): bilinear F.interpolate(align_corners=True) fallback for mismatched
    # spatial sizes is not implemented; logits and target spatial sizes must match.
    assert (n, h, w) == (nt, ht, wt), "spatial mismatch not supported"
    for lv in levels:
        assert lv.shape == (n, c, h, w)

    # Free (metadata-only) reshapes: no transpose, no dtype copy of the big tensors.
    lev2 = [lv.reshape(n, c, hw) for lv in levels]
    tgt = target.reshape(n, 1, hw).astype(jnp.int32)
    wts = jnp.asarray(cls_weights, jnp.float32).reshape(c, 1)

    # Pixel-tile size: multiple of 128 (lane width), masked remainder handled in-kernel.
    tile_p = max(128, (int(tile_p) // 128) * 128)
    if hw <= tile_p:
        tp = hw                       # full-extent block (any size allowed)
        num_tiles = 1
    else:
        tp = tile_p
        num_tiles = pl.cdiv(hw, tp)

    n_levels = len(lev2)
    n_out = n_levels + 1              # focal + wnll per gt level + weight sum

    kernel = functools.partial(
        _gt_focal_kernel,
        hw=hw, num_classes=num_classes, alpha=alpha, gamma=gamma, n_levels=n_levels)

    tgt_spec = pl.BlockSpec((None, 1, tp), lambda i, j: (i, 0, j))
    w_spec = pl.BlockSpec((c, 1), lambda i, j: (0, 0))
    lev_spec = pl.BlockSpec((None, c, tp), lambda i, j: (i, 0, j))
    out_spec = pl.BlockSpec((None, 1, 1), lambda i, j: (i, 0, 0))

    return pl.pallas_call(
        kernel,
        out_shape=tuple(jax.ShapeDtypeStruct((n, 1, 1), jnp.float32)
                        for _ in range(n_out)),
        grid_spec=pltpu.PrefetchScalarGridSpec(
            num_scalar_prefetch=0,
            grid=(n, num_tiles),
            in_specs=[tgt_spec, w_spec] + [lev_spec] * n_levels,
            out_specs=tuple(out_spec for _ in range(n_out)),
            scratch_shapes=[pltpu.VMEM((1, tp), jnp.float32) for _ in range(n_out)],
        ),
        compiler_params=pltpu.CompilerParams(
            dimension_semantics=("parallel", "arbitrary")),
    )(tgt, wts, *lev2)


def gt_focal_loss(gt_pre, out, target, cls_weights, num_classes=21,
                  alpha=0.5, gamma=2, tile_p=2048):
    """Pallas implementation of GT_FocalLoss.forward."""
    assert len(gt_pre) == 5
    n, c, h, w = out.shape
    p = n * h * w

    levels = (out,) + tuple(gt_pre)   # level 0 = `out`, levels 1..5 = gt_pre5..gt_pre1
    sums = _fused_sums(levels, target, cls_weights, num_classes, alpha, gamma, tile_p)

    focal_sum = jnp.sum(sums[0])
    wsum = jnp.sum(sums[-1])

    # Focal_Loss: mean over ALL pixels (ignored pixels contribute 0).
    focal = focal_sum / jnp.float32(p)

    # gt_loss = 0.1*CE(gt_pre5) + 0.2*CE(gt_pre4) + 0.3*CE(gt_pre3)
    #         + 0.4*CE(gt_pre2) + 0.5*CE(gt_pre1)   (CE = weighted mean)
    coeffs = (0.1, 0.2, 0.3, 0.4, 0.5)
    gt_loss = jnp.float32(0.0)
    for k, coef in enumerate(coeffs):
        gt_loss = gt_loss + jnp.float32(coef) * (jnp.sum(sums[1 + k]) / wsum)

    return focal + gt_loss


# ---------------------------------------------------------------------------
# Pure-JAX reference (mirrors the PyTorch semantics) for correctness checking.
# ---------------------------------------------------------------------------
def _ref_per_pixel(logits_nchw, target, cls_weights, num_classes):
    n, c, h, w = logits_nchw.shape
    x = jnp.transpose(logits_nchw, (0, 2, 3, 1)).reshape(-1, c).astype(jnp.float32)
    t = target.reshape(-1)
    logp = jax.nn.log_softmax(x, axis=-1)
    valid = t != num_classes
    ts = jnp.where(valid, t, 0)
    lp_t = jnp.take_along_axis(logp, ts[:, None], axis=-1)[:, 0]
    w_t = jnp.asarray(cls_weights, jnp.float32)[ts]
    ce = jnp.where(valid, -w_t * lp_t, 0.0)
    w_eff = jnp.where(valid, w_t, 0.0)
    return ce, w_eff


def _ref_gt_focal_loss(gt_pre, out, target, cls_weights, num_classes=21,
                       alpha=0.5, gamma=2):
    ce, _ = _ref_per_pixel(out, target, cls_weights, num_classes)
    logpt = -ce
    pt = jnp.exp(logpt)
    focal = jnp.mean(-((1.0 - pt) ** gamma) * (alpha * logpt))
    coeffs = (0.1, 0.2, 0.3, 0.4, 0.5)
    gt_loss = 0.0
    for gp, coef in zip(gt_pre, coeffs):
        ce_k, w_k = _ref_per_pixel(gp, target, cls_weights, num_classes)
        gt_loss = gt_loss + coef * (jnp.sum(ce_k) / jnp.sum(w_k))
    return focal + gt_loss


if __name__ == "__main__":
    num_classes = 21
    key = jax.random.PRNGKey(0)

    # Deterministic per-class weights (stand-in for the `cls_weights` ctor arg).
    cls_weights = 0.5 + jnp.arange(num_classes, dtype=jnp.float32) / num_classes

    # --- Case 1: standard shape, single full tile per sample ---
    N, C, H, W = 2, num_classes, 16, 16
    key, k_out, k_tgt, k1, k2, k3, k4, k5 = jax.random.split(key, 8)
    out = jax.random.normal(k_out, (N, C, H, W), dtype=jnp.float32)
    # Targets in [0, num_classes]; value == num_classes exercises ignore_index.
    target = jax.random.randint(k_tgt, (N, H, W), 0, num_classes + 1, dtype=jnp.int32)
    gt_pre = tuple(jax.random.normal(k, (N, C, H, W), dtype=jnp.float32)
                   for k in (k1, k2, k3, k4, k5))

    loss = gt_focal_loss(gt_pre, out, target, cls_weights, num_classes)
    loss = jax.block_until_ready(loss)
    ref = _ref_gt_focal_loss(gt_pre, out, target, cls_weights, num_classes)
    assert jnp.allclose(loss, ref, rtol=1e-4, atol=1e-5), (loss, ref)

    # --- Case 2: non-multiple-of-tile pixel count to exercise the masked last tile ---
    H2, W2 = 16, 12                      # hw = 192, tile_p = 128 -> 2 tiles, last partial
    key, k_out, k_tgt, k1, k2, k3, k4, k5 = jax.random.split(key, 8)
    out2 = jax.random.normal(k_out, (N, C, H2, W2), dtype=jnp.float32)
    target2 = jax.random.randint(k_tgt, (N, H2, W2), 0, num_classes + 1,
                                 dtype=jnp.int32)
    gt_pre2 = tuple(jax.random.normal(k, (N, C, H2, W2), dtype=jnp.float32)
                    for k in (k1, k2, k3, k4, k5))

    loss2 = gt_focal_loss(gt_pre2, out2, target2, cls_weights, num_classes, tile_p=128)
    loss2 = jax.block_until_ready(loss2)
    ref2 = _ref_gt_focal_loss(gt_pre2, out2, target2, cls_weights, num_classes)
    assert jnp.allclose(loss2, ref2, rtol=1e-4, atol=1e-5), (loss2, ref2)

    print("KERNEL_OK")
</pallas_src>

<mosaic_0001>
module attributes {stable_mosaic.version = 11 : i64} {
  func.func @_gt_focal_kernel(%arg0: i32, %arg1: i32, %arg2: memref<1x1x256xi32, #tpu.memory_space<vmem>>, %arg3: memref<21x1xf32, #tpu.memory_space<vmem>>, %arg4: memref<1x21x256xf32, #tpu.memory_space<vmem>>, %arg5: memref<1x21x256xf32, #tpu.memory_space<vmem>>, %arg6: memref<1x21x256xf32, #tpu.memory_space<vmem>>, %arg7: memref<1x21x256xf32, #tpu.memory_space<vmem>>, %arg8: memref<1x21x256xf32, #tpu.memory_space<vmem>>, %arg9: memref<1x21x256xf32, #tpu.memory_space<vmem>>, %arg10: memref<1x1x1xf32, #tpu.memory_space<vmem>>, %arg11: memref<1x1x1xf32, #tpu.memory_space<vmem>>, %arg12: memref<1x1x1xf32, #tpu.memory_space<vmem>>, %arg13: memref<1x1x1xf32, #tpu.memory_space<vmem>>, %arg14: memref<1x1x1xf32, #tpu.memory_space<vmem>>, %arg15: memref<1x1x1xf32, #tpu.memory_space<vmem>>, %arg16: memref<1x1x1xf32, #tpu.memory_space<vmem>>, %arg17: memref<1x256xf32, #tpu.memory_space<vmem>>, %arg18: memref<1x256xf32, #tpu.memory_space<vmem>>, %arg19: memref<1x256xf32, #tpu.memory_space<vmem>>, %arg20: memref<1x256xf32, #tpu.memory_space<vmem>>, %arg21: memref<1x256xf32, #tpu.memory_space<vmem>>, %arg22: memref<1x256xf32, #tpu.memory_space<vmem>>, %arg23: memref<1x256xf32, #tpu.memory_space<vmem>>) attributes {dimension_semantics = [#tpu.dimension_semantics<parallel>, #tpu.dimension_semantics<arbitrary>], iteration_bounds = array<i64: 2, 1>, scalar_prefetch = 0 : i64, scratch_operands = 7 : i64, tpu.core_type = #tpu.core_type<tc>, window_params = [{transform_indices = @transform_0, window_bounds = array<i64: 1, 1, 256>}, {pipeline_mode = #tpu.pipeline_mode<synchronous>, transform_indices = @transform_1, window_bounds = array<i64: 21, 1>}, {transform_indices = @transform_2, window_bounds = array<i64: 1, 21, 256>}, {transform_indices = @transform_3, window_bounds = array<i64: 1, 21, 256>}, {transform_indices = @transform_4, window_bounds = array<i64: 1, 21, 256>}, {transform_indices = @transform_5, window_bounds = array<i64: 1, 21, 256>}, {transform_indices = @transform_6, window_bounds = array<i64: 1, 21, 256>}, {transform_indices = @transform_7, window_bounds = array<i64: 1, 21, 256>}, {transform_indices = @transform_8, window_bounds = array<i64: 1, 1, 1>}, {transform_indices = @transform_9, window_bounds = array<i64: 1, 1, 1>}, {transform_indices = @transform_10, window_bounds = array<i64: 1, 1, 1>}, {transform_indices = @transform_11, window_bounds = array<i64: 1, 1, 1>}, {transform_indices = @transform_12, window_bounds = array<i64: 1, 1, 1>}, {transform_indices = @transform_13, window_bounds = array<i64: 1, 1, 1>}, {transform_indices = @transform_14, window_bounds = array<i64: 1, 1, 1>}]} {
    %c0_i32 = arith.constant 0 : i32
    %0 = arith.cmpi eq, %arg1, %c0_i32 : i32
    %1 = arith.extui %0 : i1 to i32
    %c0_i32_0 = arith.constant 0 : i32
    %2 = arith.cmpi ne, %1, %c0_i32_0 : i32
    scf.if %2 {
      %cst_88 = arith.constant 0.000000e+00 : f32
      %173 = vector.broadcast %cst_88 : f32 to vector<1x256xf32>
      %c0_89 = arith.constant 0 : index
      %c0_90 = arith.constant 0 : index
      %174 = vector.load %arg17[%c0_89, %c0_90] : memref<1x256xf32, #tpu.memory_space<vmem>>, vector<1x256xf32>
      tpu.vector_store %arg17[%c0_89, %c0_90], %173 {strides = array<i32>} : memref<1x256xf32, #tpu.memory_space<vmem>>, vector<1x256xf32>,
      %cst_91 = arith.constant 0.000000e+00 : f32
      %175 = vector.broadcast %cst_91 : f32 to vector<1x256xf32>
      %c0_92 = arith.constant 0 : index
      %c0_93 = arith.constant 0 : index
      %176 = vector.load %arg18[%c0_92, %c0_93] : memref<1x256xf32, #tpu.memory_space<vmem>>, vector<1x256xf32>
      tpu.vector_store %arg18[%c0_92, %c0_93], %175 {strides = array<i32>} : memref<1x256xf32, #tpu.memory_space<vmem>>, vector<1x256xf32>,
      %cst_94 = arith.constant 0.000000e+00 : f32
      %177 = vector.broadcast %cst_94 : f32 to vector<1x256xf32>
      %c0_95 = arith.constant 0 : index
      %c0_96 = arith.constant 0 : index
      %178 = vector.load %arg19[%c0_95, %c0_96] : memref<1x256xf32, #tpu.memory_space<vmem>>, vector<1x256xf32>
      tpu.vector_store %arg19[%c0_95, %c0_96], %177 {strides = array<i32>} : memref<1x256xf32, #tpu.memory_space<vmem>>, vector<1x256xf32>,
      %cst_97 = arith.constant 0.000000e+00 : f32
      %179 = vector.broadcast %cst_97 : f32 to vector<1x256xf32>
      %c0_98 = arith.constant 0 : index
      %c0_99 = arith.constant 0 : index
      %180 = vector.load %arg20[%c0_98, %c0_99] : memref<1x256xf32, #tpu.memory_space<vmem>>, vector<1x256xf32>
      tpu.vector_store %arg20[%c0_98, %c0_99], %179 {strides = array<i32>} : memref<1x256xf32, #tpu.memory_space<vmem>>, vector<1x256xf32>,
      %cst_100 = arith.constant 0.000000e+00 : f32
      %181 = vector.broadcast %cst_100 : f32 to vector<1x256xf32>
      %c0_101 = arith.constant 0 : index
      %c0_102 = arith.constant 0 : index
      %182 = vector.load %arg21[%c0_101, %c0_102] : memref<1x256xf32, #tpu.memory_space<vmem>>, vector<1x256xf32>
      tpu.vector_store %arg21[%c0_101, %c0_102], %181 {strides = array<i32>} : memref<1x256xf32, #tpu.memory_space<vmem>>, vector<1x256xf32>,
      %cst_103 = arith.constant 0.000000e+00 : f32
      %183 = vector.broadcast %cst_103 : f32 to vector<1x256xf32>
      %c0_104 = arith.constant 0 : index
      %c0_105 = arith.constant 0 : index
      %184 = vector.load %arg22[%c0_104, %c0_105] : memref<1x256xf32, #tpu.memory_space<vmem>>, vector<1x256xf32>
      tpu.vector_store %arg22[%c0_104, %c0_105], %183 {strides = array<i32>} : memref<1x256xf32, #tpu.memory_space<vmem>>, vector<1x256xf32>,
      %cst_106 = arith.constant 0.000000e+00 : f32
      %185 = vector.broadcast %cst_106 : f32 to vector<1x256xf32>
      %c0_107 = arith.constant 0 : index
      %c0_108 = arith.constant 0 : index
      %186 = vector.load %arg23[%c0_107, %c0_108] : memref<1x256xf32, #tpu.memory_space<vmem>>, vector<1x256xf32>
      tpu.vector_store %arg23[%c0_107, %c0_108], %185 {strides = array<i32>} : memref<1x256xf32, #tpu.memory_space<vmem>>, vector<1x256xf32>,
    } else {
    }
    %c0 = arith.constant 0 : index
    %c0_1 = arith.constant 0 : index
    %c0_2 = arith.constant 0 : index
    %3 = vector.load %arg2[%c0, %c0_1, %c0_2] : memref<1x1x256xi32, #tpu.memory_space<vmem>>, vector<1x1x256xi32>
    %4 = vector.shape_cast %3 : vector<1x1x256xi32> to vector<1x256xi32>
    %c0_3 = arith.constant 0 : index
    %c0_4 = arith.constant 0 : index
    %5 = vector.load %arg3[%c0_3, %c0_4] : memref<21x1xf32, #tpu.memory_space<vmem>>, vector<21x1xf32>
    %6 = tpu.iota {dimensions = array<i32: 1>} : vector<1x256xi32>
    %c256_i32 = arith.constant 256 : i32
    %7 = arith.muli %arg1, %c256_i32 : i32
    %8 = vector.broadcast %7 : i32 to vector<1x256xi32>
    %9 = arith.addi %8, %6 : vector<1x256xi32>
    %c256_i32_5 = arith.constant 256 : i32
    %10 = vector.broadcast %c256_i32_5 : i32 to vector<1x256xi32>
    %11 = arith.cmpi slt, %9, %10 : vector<1x256xi32>
    %c21_i32 = arith.constant 21 : i32
    %12 = vector.broadcast %c21_i32 : i32 to vector<1x256xi32>
    %13 = arith.cmpi ne, %4, %12 : vector<1x256xi32>
    %14 = arith.andi %13, %11 : vector<1x256xi1>
    %c0_i32_6 = arith.constant 0 : i32
    %15 = vector.broadcast %c0_i32_6 : i32 to vector<1x256xi32>
    %16 = arith.select %14, %4, %15 : vector<1x256xi1>, vector<1x256xi32>
    %17 = tpu.iota {dimensions = array<i32: 0>} : vector<21x256xi32>
    %18 = vector.broadcast %16 : vector<1x256xi32> to vector<21x256xi32>
    %19 = arith.cmpi eq, %17, %18 : vector<21x256xi32>
    %20 = arith.extui %19 : vector<21x256xi1> to vector<21x256xi32>
    %21 = arith.sitofp %20 : vector<21x256xi32> to vector<21x256xf32>
    %22 = vector.broadcast %5 : vector<21x1xf32> to vector<21x256xf32>
    %23 = arith.mulf %21, %22 : vector<21x256xf32>
    %cst = arith.constant dense<0.000000e+00> : vector<256xf32>
    %24 = vector.multi_reduction <add>, %23, %cst [0] : vector<21x256xf32> to vector<256xf32>
    %25 = vector.shape_cast %24 : vector<256xf32> to vector<1x256xf32>
    %c0_7 = arith.constant 0 : index
    %c0_8 = arith.constant 0 : index
    %c0_9 = arith.constant 0 : index
    %26 = vector.load %arg4[%c0_7, %c0_8, %c0_9] : memref<1x21x256xf32, #tpu.memory_space<vmem>>, vector<1x21x256xf32>
    %27 = vector.shape_cast %26 : vector<1x21x256xf32> to vector<21x256xf32>
    %cst_10 = arith.constant dense<0xFF800000> : vector<256xf32>
    %28 = vector.multi_reduction <maximumf>, %27, %cst_10 [0] : vector<21x256xf32> to vector<256xf32>
    %29 = vector.shape_cast %28 : vector<256xf32> to vector<1x256xf32>
    %30 = vector.broadcast %29 : vector<1x256xf32> to vector<21x256xf32>
    %31 = arith.subf %27, %30 : vector<21x256xf32>
    %32 = math.exp %31 : vector<21x256xf32>
    %cst_11 = arith.constant dense<0.000000e+00> : vector<256xf32>
    %33 = vector.multi_reduction <add>, %32, %cst_11 [0] : vector<21x256xf32> to vector<256xf32>
    %34 = vector.shape_cast %33 : vector<256xf32> to vector<1x256xf32>
    %35 = math.log %34 : vector<1x256xf32>
    %36 = arith.mulf %21, %31 : vector<21x256xf32>
    %cst_12 = arith.constant dense<0.000000e+00> : vector<256xf32>
    %37 = vector.multi_reduction <add>, %36, %cst_12 [0] : vector<21x256xf32> to vector<256xf32>
    %38 = vector.shape_cast %37 : vector<256xf32> to vector<1x256xf32>
    %39 = arith.subf %38, %35 : vector<1x256xf32>
    %40 = arith.mulf %25, %39 : vector<1x256xf32>
    %cst_13 = arith.constant 0.000000e+00 : f32
    %41 = vector.broadcast %cst_13 : f32 to vector<1x256xf32>
    %42 = arith.select %14, %40, %41 : vector<1x256xi1>, vector<1x256xf32>
    %43 = math.exp %42 : vector<1x256xf32>
    %cst_14 = arith.constant 1.000000e+00 : f32
    %44 = vector.broadcast %cst_14 : f32 to vector<1x256xf32>
    %45 = arith.subf %44, %43 : vector<1x256xf32>
    %46 = arith.mulf %45, %45 : vector<1x256xf32>
    %cst_15 = arith.constant 5.000000e-01 : f32
    %47 = vector.broadcast %cst_15 : f32 to vector<1x256xf32>
    %48 = arith.mulf %47, %42 : vector<1x256xf32>
    %c0_16 = arith.constant 0 : index
    %c0_17 = arith.constant 0 : index
    %49 = vector.load %arg17[%c0_16, %c0_17] : memref<1x256xf32, #tpu.memory_space<vmem>>, vector<1x256xf32>
    %cst_18 = arith.constant 0.000000e+00 : f32
    %50 = vector.broadcast %cst_18 : f32 to vector<1x256xf32>
    %51 = arith.subf %50, %46 : vector<1x256xf32>
    %52 = arith.mulf %51, %48 : vector<1x256xf32>
    %53 = arith.addf %49, %52 : vector<1x256xf32>
    %c0_19 = arith.constant 0 : index
    %c0_20 = arith.constant 0 : index
    %54 = vector.load %arg17[%c0_19, %c0_20] : memref<1x256xf32, #tpu.memory_space<vmem>>, vector<1x256xf32>
    tpu.vector_store %arg17[%c0_19, %c0_20], %53 {strides = array<i32>} : memref<1x256xf32, #tpu.memory_space<vmem>>, vector<1x256xf32>,
    %c0_21 = arith.constant 0 : index
    %c0_22 = arith.constant 0 : index
    %55 = vector.load %arg23[%c0_21, %c0_22] : memref<1x256xf32, #tpu.memory_space<vmem>>, vector<1x256xf32>
    %cst_23 = arith.constant 0.000000e+00 : f32
    %56 = vector.broadcast %cst_23 : f32 to vector<1x256xf32>
    %57 = arith.select %14, %25, %56 : vector<1x256xi1>, vector<1x256xf32>
    %58 = arith.addf %55, %57 : vector<1x256xf32>
    %c0_24 = arith.constant 0 : index
    %c0_25 = arith.constant 0 : index
    %59 = vector.load %arg23[%c0_24, %c0_25] : memref<1x256xf32, #tpu.memory_space<vmem>>, vector<1x256xf32>
    tpu.vector_store %arg23[%c0_24, %c0_25], %58 {strides = array<i32>} : memref<1x256xf32, #tpu.memory_space<vmem>>, vector<1x256xf32>,
    %c0_26 = arith.constant 0 : index
    %c0_27 = arith.constant 0 : index
    %60 = vector.load %arg18[%c0_26, %c0_27] : memref<1x256xf32, #tpu.memory_space<vmem>>, vector<1x256xf32>
    %c0_28 = arith.constant 0 : index
    %c0_29 = arith.constant 0 : index
    %c0_30 = arith.constant 0 : index
    %61 = vector.load %arg5[%c0_28, %c0_29, %c0_30] : memref<1x21x256xf32, #tpu.memory_space<vmem>>, vector<1x21x256xf32>
    %62 = vector.shape_cast %61 : vector<1x21x256xf32> to vector<21x256xf32>
    %cst_31 = arith.constant dense<0xFF800000> : vector<256xf32>
    %63 = vector.multi_reduction <maximumf>, %62, %cst_31 [0] : vector<21x256xf32> to vector<256xf32>
    %64 = vector.shape_cast %63 : vector<256xf32> to vector<1x256xf32>
    %65 = vector.broadcast %64 : vector<1x256xf32> to vector<21x256xf32>
    %66 = arith.subf %62, %65 : vector<21x256xf32>
    %67 = math.exp %66 : vector<21x256xf32>
    %cst_32 = arith.constant dense<0.000000e+00> : vector<256xf32>
    %68 = vector.multi_reduction <add>, %67, %cst_32 [0] : vector<21x256xf32> to vector<256xf32>
    %69 = vector.shape_cast %68 : vector<256xf32> to vector<1x256xf32>
    %70 = math.log %69 : vector<1x256xf32>
    %71 = arith.mulf %21, %66 : vector<21x256xf32>
    %cst_33 = arith.constant dense<0.000000e+00> : vector<256xf32>
    %72 = vector.multi_reduction <add>, %71, %cst_33 [0] : vector<21x256xf32> to vector<256xf32>
    %73 = vector.shape_cast %72 : vector<256xf32> to vector<1x256xf32>
    %74 = arith.subf %73, %70 : vector<1x256xf32>
    %75 = arith.mulf %25, %74 : vector<1x256xf32>
    %cst_34 = arith.constant 0.000000e+00 : f32
    %76 = vector.broadcast %cst_34 : f32 to vector<1x256xf32>
    %77 = arith.select %14, %75, %76 : vector<1x256xi1>, vector<1x256xf32>
    %cst_35 = arith.constant 0.000000e+00 : f32
    %78 = vector.broadcast %cst_35 : f32 to vector<1x256xf32>
    %79 = arith.subf %78, %77 : vector<1x256xf32>
    %80 = arith.addf %60, %79 : vector<1x256xf32>
    %c0_36 = arith.constant 0 : index
    %c0_37 = arith.constant 0 : index
    %81 = vector.load %arg18[%c0_36, %c0_37] : memref<1x256xf32, #tpu.memory_space<vmem>>, vector<1x256xf32>
    tpu.vector_store %arg18[%c0_36, %c0_37], %80 {strides = array<i32>} : memref<1x256xf32, #tpu.memory_space<vmem>>, vector<1x256xf32>,
    %c0_38 = arith.constant 0 : index
    %c0_39 = arith.constant 0 : index
    %82 = vector.load %arg19[%c0_38, %c0_39] : memref<1x256xf32, #tpu.memory_space<vmem>>, vector<1x256xf32>
    %c0_40 = arith.constant 0 : index
    %c0_41 = arith.constant 0 : index
    %c0_42 = arith.constant 0 : index
    %83 = vector.load %arg6[%c0_40, %c0_41, %c0_42] : memref<1x21x256xf32, #tpu.memory_space<vmem>>, vector<1x21x256xf32>
    %84 = vector.shape_cast %83 : vector<1x21x256xf32> to vector<21x256xf32>
    %cst_43 = arith.constant dense<0xFF800000> : vector<256xf32>
    %85 = vector.multi_reduction <maximumf>, %84, %cst_43 [0] : vector<21x256xf32> to vector<256xf32>
    %86 = vector.shape_cast %85 : vector<256xf32> to vector<1x256xf32>
    %87 = vector.broadcast %86 : vector<1x256xf32> to vector<21x256xf32>
    %88 = arith.subf %84, %87 : vector<21x256xf32>
    %89 = math.exp %88 : vector<21x256xf32>
    %cst_44 = arith.constant dense<0.000000e+00> : vector<256xf32>
    %90 = vector.multi_reduction <add>, %89, %cst_44 [0] : vector<21x256xf32> to vector<256xf32>
    %91 = vector.shape_cast %90 : vector<256xf32> to vector<1x256xf32>
    %92 = math.log %91 : vector<1x256xf32>
    %93 = arith.mulf %21, %88 : vector<21x256xf32>
    %cst_45 = arith.constant dense<0.000000e+00> : vector<256xf32>
    %94 = vector.multi_reduction <add>, %93, %cst_45 [0] : vector<21x256xf32> to vector<256xf32>
    %95 = vector.shape_cast %94 : vector<256xf32> to vector<1x256xf32>
    %96 = arith.subf %95, %92 : vector<1x256xf32>
    %97 = arith.mulf %25, %96 : vector<1x256xf32>
    %cst_46 = arith.constant 0.000000e+00 : f32
    %98 = vector.broadcast %cst_46 : f32 to vector<1x256xf32>
    %99 = arith.select %14, %97, %98 : vector<1x256xi1>, vector<1x256xf32>
    %cst_47 = arith.constant 0.000000e+00 : f32
    %100 = vector.broadcast %cst_47 : f32 to vector<1x256xf32>
    %101 = arith.subf %100, %99 : vector<1x256xf32>
    %102 = arith.addf %82, %101 : vector<1x256xf32>
    %c0_48 = arith.constant 0 : index
    %c0_49 = arith.constant 0 : index
    %103 = vector.load %arg19[%c0_48, %c0_49] : memref<1x256xf32, #tpu.memory_space<vmem>>, vector<1x256xf32>
    tpu.vector_store %arg19[%c0_48, %c0_49], %102 {strides = array<i32>} : memref<1x256xf32, #tpu.memory_space<vmem>>, vector<1x256xf32>,
    %c0_50 = arith.constant 0 : index
    %c0_51 = arith.constant 0 : index
    %104 = vector.load %arg20[%c0_50, %c0_51] : memref<1x256xf32, #tpu.memory_space<vmem>>, vector<1x256xf32>
    %c0_52 = arith.constant 0 : index
    %c0_53 = arith.constant 0 : index
    %c0_54 = arith.constant 0 : index
    %105 = vector.load %arg7[%c0_52, %c0_53, %c0_54] : memref<1x21x256xf32, #tpu.memory_space<vmem>>, vector<1x21x256xf32>
    %106 = vector.shape_cast %105 : vector<1x21x256xf32> to vector<21x256xf32>
    %cst_55 = arith.constant dense<0xFF800000> : vector<256xf32>
    %107 = vector.multi_reduction <maximumf>, %106, %cst_55 [0] : vector<21x256xf32> to vector<256xf32>
    %108 = vector.shape_cast %107 : vector<256xf32> to vector<1x256xf32>
    %109 = vector.broadcast %108 : vector<1x256xf32> to vector<21x256xf32>
    %110 = arith.subf %106, %109 : vector<21x256xf32>
    %111 = math.exp %110 : vector<21x256xf32>
    %cst_56 = arith.constant dense<0.000000e+00> : vector<256xf32>
    %112 = vector.multi_reduction <add>, %111, %cst_56 [0] : vector<21x256xf32> to vector<256xf32>
    %113 = vector.shape_cast %112 : vector<256xf32> to vector<1x256xf32>
    %114 = math.log %113 : vector<1x256xf32>
    %115 = arith.mulf %21, %110 : vector<21x256xf32>
    %cst_57 = arith.constant dense<0.000000e+00> : vector<256xf32>
    %116 = vector.multi_reduction <add>, %115, %cst_57 [0] : vector<21x256xf32> to vector<256xf32>
    %117 = vector.shape_cast %116 : vector<256xf32> to vector<1x256xf32>
    %118 = arith.subf %117, %114 : vector<1x256xf32>
    %119 = arith.mulf %25, %118 : vector<1x256xf32>
    %cst_58 = arith.constant 0.000000e+00 : f32
    %120 = vector.broadcast %cst_58 : f32 to vector<1x256xf32>
    %121 = arith.select %14, %119, %120 : vector<1x256xi1>, vector<1x256xf32>
    %cst_59 = arith.constant 0.000000e+00 : f32
    %122 = vector.broadcast %cst_59 : f32 to vector<1x256xf32>
    %123 = arith.subf %122, %121 : vector<1x256xf32>
    %124 = arith.addf %104, %123 : vector<1x256xf32>
    %c0_60 = arith.constant 0 : index
    %c0_61 = arith.constant 0 : index
    %125 = vector.load %arg20[%c0_60, %c0_61] : memref<1x256xf32, #tpu.memory_space<vmem>>, vector<1x256xf32>
    tpu.vector_store %arg20[%c0_60, %c0_61], %124 {strides = array<i32>} : memref<1x256xf32, #tpu.memory_space<vmem>>, vector<1x256xf32>,
    %c0_62 = arith.constant 0 : index
    %c0_63 = arith.constant 0 : index
    %126 = vector.load %arg21[%c0_62, %c0_63] : memref<1x256xf32, #tpu.memory_space<vmem>>, vector<1x256xf32>
    %c0_64 = arith.constant 0 : index
    %c0_65 = arith.constant 0 : index
    %c0_66 = arith.constant 0 : index
    %127 = vector.load %arg8[%c0_64, %c0_65, %c0_66] : memref<1x21x256xf32, #tpu.memory_space<vmem>>, vector<1x21x256xf32>
    %128 = vector.shape_cast %127 : vector<1x21x256xf32> to vector<21x256xf32>
    %cst_67 = arith.constant dense<0xFF800000> : vector<256xf32>
    %129 = vector.multi_reduction <maximumf>, %128, %cst_67 [0] : vector<21x256xf32> to vector<256xf32>
    %130 = vector.shape_cast %129 : vector<256xf32> to vector<1x256xf32>
    %131 = vector.broadcast %130 : vector<1x256xf32> to vector<21x256xf32>
    %132 = arith.subf %128, %131 : vector<21x256xf32>
    %133 = math.exp %132 : vector<21x256xf32>
    %cst_68 = arith.constant dense<0.000000e+00> : vector<256xf32>
    %134 = vector.multi_reduction <add>, %133, %cst_68 [0] : vector<21x256xf32> to vector<256xf32>
    %135 = vector.shape_cast %134 : vector<256xf32> to vector<1x256xf32>
    %136 = math.log %135 : vector<1x256xf32>
    %137 = arith.mulf %21, %132 : vector<21x256xf32>
    %cst_69 = arith.constant dense<0.000000e+00> : vector<256xf32>
    %138 = vector.multi_reduction <add>, %137, %cst_69 [0] : vector<21x256xf32> to vector<256xf32>
    %139 = vector.shape_cast %138 : vector<256xf32> to vector<1x256xf32>
    %140 = arith.subf %139, %136 : vector<1x256xf32>
    %141 = arith.mulf %25, %140 : vector<1x256xf32>
    %cst_70 = arith.constant 0.000000e+00 : f32
    %142 = vector.broadcast %cst_70 : f32 to vector<1x256xf32>
    %143 = arith.select %14, %141, %142 : vector<1x256xi1>, vector<1x256xf32>
    %cst_71 = arith.constant 0.000000e+00 : f32
    %144 = vector.broadcast %cst_71 : f32 to vector<1x256xf32>
    %145 = arith.subf %144, %143 : vector<1x256xf32>
    %146 = arith.addf %126, %145 : vector<1x256xf32>
    %c0_72 = arith.constant 0 : index
    %c0_73 = arith.constant 0 : index
    %147 = vector.load %arg21[%c0_72, %c0_73] : memref<1x256xf32, #tpu.memory_space<vmem>>, vector<1x256xf32>
    tpu.vector_store %arg21[%c0_72, %c0_73], %146 {strides = array<i32>} : memref<1x256xf32, #tpu.memory_space<vmem>>, vector<1x256xf32>,
    %c0_74 = arith.constant 0 : index
    %c0_75 = arith.constant 0 : index
    %148 = vector.load %arg22[%c0_74, %c0_75] : memref<1x256xf32, #tpu.memory_space<vmem>>, vector<1x256xf32>
    %c0_76 = arith.constant 0 : index
    %c0_77 = arith.constant 0 : index
    %c0_78 = arith.constant 0 : index
    %149 = vector.load %arg9[%c0_76, %c0_77, %c0_78] : memref<1x21x256xf32, #tpu.memory_space<vmem>>, vector<1x21x256xf32>
    %150 = vector.shape_cast %149 : vector<1x21x256xf32> to vector<21x256xf32>
    %cst_79 = arith.constant dense<0xFF800000> : vector<256xf32>
    %151 = vector.multi_reduction <maximumf>, %150, %cst_79 [0] : vector<21x256xf32> to vector<256xf32>
    %152 = vector.shape_cast %151 : vector<256xf32> to vector<1x256xf32>
    %153 = vector.broadcast %152 : vector<1x256xf32> to vector<21x256xf32>
    %154 = arith.subf %150, %153 : vector<21x256xf32>
    %155 = math.exp %154 : vector<21x256xf32>
    %cst_80 = arith.constant dense<0.000000e+00> : vector<256xf32>
    %156 = vector.multi_reduction <add>, %155, %cst_80 [0] : vector<21x256xf32> to vector<256xf32>
    %157 = vector.shape_cast %156 : vector<256xf32> to vector<1x256xf32>
    %158 = math.log %157 : vector<1x256xf32>
    %159 = arith.mulf %21, %154 : vector<21x256xf32>
    %cst_81 = arith.constant dense<0.000000e+00> : vector<256xf32>
    %160 = vector.multi_reduction <add>, %159, %cst_81 [0] : vector<21x256xf32> to vector<256xf32>
    %161 = vector.shape_cast %160 : vector<256xf32> to vector<1x256xf32>
    %162 = arith.subf %161, %158 : vector<1x256xf32>
    %163 = arith.mulf %25, %162 : vector<1x256xf32>
    %cst_82 = arith.constant 0.000000e+00 : f32
    %164 = vector.broadcast %cst_82 : f32 to vector<1x256xf32>
    %165 = arith.select %14, %163, %164 : vector<1x256xi1>, vector<1x256xf32>
    %cst_83 = arith.constant 0.000000e+00 : f32
    %166 = vector.broadcast %cst_83 : f32 to vector<1x256xf32>
    %167 = arith.subf %166, %165 : vector<1x256xf32>
    %168 = arith.addf %148, %167 : vector<1x256xf32>
    %c0_84 = arith.constant 0 : index
    %c0_85 = arith.constant 0 : index
    %169 = vector.load %arg22[%c0_84, %c0_85] : memref<1x256xf32, #tpu.memory_space<vmem>>, vector<1x256xf32>
    tpu.vector_store %arg22[%c0_84, %c0_85], %168 {strides = array<i32>} : memref<1x256xf32, #tpu.memory_space<vmem>>, vector<1x256xf32>,
    %c0_i32_86 = arith.constant 0 : i32
    %170 = arith.cmpi eq, %arg1, %c0_i32_86 : i32
    %171 = arith.extui %170 : i1 to i32
    %c0_i32_87 = arith.constant 0 : i32
    %172 = arith.cmpi ne, %171, %c0_i32_87 : i32
    scf.if %172 {
      %c0_88 = arith.constant 0 : index
      %c0_89 = arith.constant 0 : index
      %173 = vector.load %arg17[%c0_88, %c0_89] : memref<1x256xf32, #tpu.memory_space<vmem>>, vector<1x256xf32>
      %cst_90 = arith.constant dense<0.000000e+00> : vector<1xf32>
      %174 = vector.multi_reduction <add>, %173, %cst_90 [1] : vector<1x256xf32> to vector<1xf32>
      %175 = vector.shape_cast %174 : vector<1xf32> to vector<1x1xf32>
      %c0_91 = arith.constant 0 : index
      %c0_92 = arith.constant 0 : index
      %c0_93 = arith.constant 0 : index
      %176 = vector.load %arg10[%c0_91, %c0_92, %c0_93] : memref<1x1x1xf32, #tpu.memory_space<vmem>>, vector<1x1x1xf32>
      %177 = vector.shape_cast %176 : vector<1x1x1xf32> to vector<1x1xf32>
      %178 = vector.shape_cast %175 : vector<1x1xf32> to vector<1x1x1xf32>
      tpu.vector_store %arg10[%c0_91, %c0_92, %c0_93], %178 {strides = array<i32>} : memref<1x1x1xf32, #tpu.memory_space<vmem>>, vector<1x1x1xf32>,
      %c0_94 = arith.constant 0 : index
      %c0_95 = arith.constant 0 : index
      %179 = vector.load %arg23[%c0_94, %c0_95] : memref<1x256xf32, #tpu.memory_space<vmem>>, vector<1x256xf32>
      %cst_96 = arith.constant dense<0.000000e+00> : vector<1xf32>
      %180 = vector.multi_reduction <add>, %179, %cst_96 [1] : vector<1x256xf32> to vector<1xf32>
      %181 = vector.shape_cast %180 : vector<1xf32> to vector<1x1xf32>
      %c0_97 = arith.constant 0 : index
      %c0_98 = arith.constant 0 : index
      %c0_99 = arith.constant 0 : index
      %182 = vector.load %arg16[%c0_97, %c0_98, %c0_99] : memref<1x1x1xf32, #tpu.memory_space<vmem>>, vector<1x1x1xf32>
      %183 = vector.shape_cast %182 : vector<1x1x1xf32> to vector<1x1xf32>
      %184 = vector.shape_cast %181 : vector<1x1xf32> to vector<1x1x1xf32>
      tpu.vector_store %arg16[%c0_97, %c0_98, %c0_99], %184 {strides = array<i32>} : memref<1x1x1xf32, #tpu.memory_space<vmem>>, vector<1x1x1xf32>,
      %c0_100 = arith.constant 0 : index
      %c0_101 = arith.constant 0 : index
      %185 = vector.load %arg18[%c0_100, %c0_101] : memref<1x256xf32, #tpu.memory_space<vmem>>, vector<1x256xf32>
      %cst_102 = arith.constant dense<0.000000e+00> : vector<1xf32>
      %186 = vector.multi_reduction <add>, %185, %cst_102 [1] : vector<1x256xf32> to vector<1xf32>
      %187 = vector.shape_cast %186 : vector<1xf32> to vector<1x1xf32>
      %c0_103 = arith.constant 0 : index
      %c0_104 = arith.constant 0 : index
      %c0_105 = arith.constant 0 : index
      %188 = vector.load %arg11[%c0_103, %c0_104, %c0_105] : memref<1x1x1xf32, #tpu.memory_space<vmem>>, vector<1x1x1xf32>
      %189 = vector.shape_cast %188 : vector<1x1x1xf32> to vector<1x1xf32>
      %190 = vector.shape_cast %187 : vector<1x1xf32> to vector<1x1x1xf32>
      tpu.vector_store %arg11[%c0_103, %c0_104, %c0_105], %190 {strides = array<i32>} : memref<1x1x1xf32, #tpu.memory_space<vmem>>, vector<1x1x1xf32>,
      %c0_106 = arith.constant 0 : index
      %c0_107 = arith.constant 0 : index
      %191 = vector.load %arg19[%c0_106, %c0_107] : memref<1x256xf32, #tpu.memory_space<vmem>>, vector<1x256xf32>
      %cst_108 = arith.constant dense<0.000000e+00> : vector<1xf32>
      %192 = vector.multi_reduction <add>, %191, %cst_108 [1] : vector<1x256xf32> to vector<1xf32>
      %193 = vector.shape_cast %192 : vector<1xf32> to vector<1x1xf32>
      %c0_109 = arith.constant 0 : index
      %c0_110 = arith.constant 0 : index
      %c0_111 = arith.constant 0 : index
      %194 = vector.load %arg12[%c0_109, %c0_110, %c0_111] : memref<1x1x1xf32, #tpu.memory_space<vmem>>, vector<1x1x1xf32>
      %195 = vector.shape_cast %194 : vector<1x1x1xf32> to vector<1x1xf32>
      %196 = vector.shape_cast %193 : vector<1x1xf32> to vector<1x1x1xf32>
      tpu.vector_store %arg12[%c0_109, %c0_110, %c0_111], %196 {strides = array<i32>} : memref<1x1x1xf32, #tpu.memory_space<vmem>>, vector<1x1x1xf32>,
      %c0_112 = arith.constant 0 : index
      %c0_113 = arith.constant 0 : index
      %197 = vector.load %arg20[%c0_112, %c0_113] : memref<1x256xf32, #tpu.memory_space<vmem>>, vector<1x256xf32>
      %cst_114 = arith.constant dense<0.000000e+00> : vector<1xf32>
      %198 = vector.multi_reduction <add>, %197, %cst_114 [1] : vector<1x256xf32> to vector<1xf32>
      %199 = vector.shape_cast %198 : vector<1xf32> to vector<1x1xf32>
      %c0_115 = arith.constant 0 : index
      %c0_116 = arith.constant 0 : index
      %c0_117 = arith.constant 0 : index
      %200 = vector.load %arg13[%c0_115, %c0_116, %c0_117] : memref<1x1x1xf32, #tpu.memory_space<vmem>>, vector<1x1x1xf32>
      %201 = vector.shape_cast %200 : vector<1x1x1xf32> to vector<1x1xf32>
      %202 = vector.shape_cast %199 : vector<1x1xf32> to vector<1x1x1xf32>
      tpu.vector_store %arg13[%c0_115, %c0_116, %c0_117], %202 {strides = array<i32>} : memref<1x1x1xf32, #tpu.memory_space<vmem>>, vector<1x1x1xf32>,
      %c0_118 = arith.constant 0 : index
      %c0_119 = arith.constant 0 : index
      %203 = vector.load %arg21[%c0_118, %c0_119] : memref<1x256xf32, #tpu.memory_space<vmem>>, vector<1x256xf32>
      %cst_120 = arith.constant dense<0.000000e+00> : vector<1xf32>
      %204 = vector.multi_reduction <add>, %203, %cst_120 [1] : vector<1x256xf32> to vector<1xf32>
      %205 = vector.shape_cast %204 : vector<1xf32> to vector<1x1xf32>
      %c0_121 = arith.constant 0 : index
      %c0_122 = arith.constant 0 : index
      %c0_123 = arith.constant 0 : index
      %206 = vector.load %arg14[%c0_121, %c0_122, %c0_123] : memref<1x1x1xf32, #tpu.memory_space<vmem>>, vector<1x1x1xf32>
      %207 = vector.shape_cast %206 : vector<1x1x1xf32> to vector<1x1xf32>
      %208 = vector.shape_cast %205 : vector<1x1xf32> to vector<1x1x1xf32>
      tpu.vector_store %arg14[%c0_121, %c0_122, %c0_123], %208 {strides = array<i32>} : memref<1x1x1xf32, #tpu.memory_space<vmem>>, vector<1x1x1xf32>,
      %c0_124 = arith.constant 0 : index
      %c0_125 = arith.constant 0 : index
      %209 = vector.load %arg22[%c0_124, %c0_125] : memref<1x256xf32, #tpu.memory_space<vmem>>, vector<1x256xf32>
      %cst_126 = arith.constant dense<0.000000e+00> : vector<1xf32>
      %210 = vector.multi_reduction <add>, %209, %cst_126 [1] : vector<1x256xf32> to vector<1xf32>
      %211 = vector.shape_cast %210 : vector<1xf32> to vector<1x1xf32>
      %c0_127 = arith.constant 0 : index
      %c0_128 = arith.constant 0 : index
      %c0_129 = arith.constant 0 : index
      %212 = vector.load %arg15[%c0_127, %c0_128, %c0_129] : memref<1x1x1xf32, #tpu.memory_space<vmem>>, vector<1x1x1xf32>
      %213 = vector.shape_cast %212 : vector<1x1x1xf32> to vector<1x1xf32>
      %214 = vector.shape_cast %211 : vector<1x1xf32> to vector<1x1x1xf32>
      tpu.vector_store %arg15[%c0_127, %c0_128, %c0_129], %214 {strides = array<i32>} : memref<1x1x1xf32, #tpu.memory_space<vmem>>, vector<1x1x1xf32>,
    } else {
    }
    return
  }
  func.func @transform_0(%arg0: i32, %arg1: i32) -> (i32, i32, i32) {
    %c0_i32 = arith.constant 0 : i32
    %c0_i32_0 = arith.constant 0 : i32
    return %arg0, %c0_i32, %arg1 : i32, i32, i32
  }
  func.func @transform_1(%arg0: i32, %arg1: i32) -> (i32, i32) {
    %c0_i32 = arith.constant 0 : i32
    %c0_i32_0 = arith.constant 0 : i32
    %c0_i32_1 = arith.constant 0 : i32
    return %c0_i32, %c0_i32_0 : i32, i32
  }
  func.func @transform_2(%arg0: i32, %arg1: i32) -> (i32, i32, i32) {
    %c0_i32 = arith.constant 0 : i32
    %c0_i32_0 = arith.constant 0 : i32
    return %arg0, %c0_i32, %arg1 : i32, i32, i32
  }
  func.func @transform_3(%arg0: i32, %arg1: i32) -> (i32, i32, i32) {
    %c0_i32 = arith.constant 0 : i32
    %c0_i32_0 = arith.constant 0 : i32
    return %arg0, %c0_i32, %arg1 : i32, i32, i32
  }
  func.func @transform_4(%arg0: i32, %arg1: i32) -> (i32, i32, i32) {
    %c0_i32 = arith.constant 0 : i32
    %c0_i32_0 = arith.constant 0 : i32
    return %arg0, %c0_i32, %arg1 : i32, i32, i32
  }
  func.func @transform_5(%arg0: i32, %arg1: i32) -> (i32, i32, i32) {
    %c0_i32 = arith.constant 0 : i32
    %c0_i32_0 = arith.constant 0 : i32
    return %arg0, %c0_i32, %arg1 : i32, i32, i32
  }
  func.func @transform_6(%arg0: i32, %arg1: i32) -> (i32, i32, i32) {
    %c0_i32 = arith.constant 0 : i32
    %c0_i32_0 = arith.constant 0 : i32
    return %arg0, %c0_i32, %arg1 : i32, i32, i32
  }
  func.func @transform_7(%arg0: i32, %arg1: i32) -> (i32, i32, i32) {
    %c0_i32 = arith.constant 0 : i32
    %c0_i32_0 = arith.constant 0 : i32
    return %arg0, %c0_i32, %arg1 : i32, i32, i32
  }
  func.func @transform_8(%arg0: i32, %arg1: i32) -> (i32, i32, i32) {
    %c0_i32 = arith.constant 0 : i32
    %c0_i32_0 = arith.constant 0 : i32
    %c0_i32_1 = arith.constant 0 : i32
    return %arg0, %c0_i32, %c0_i32_0 : i32, i32, i32
  }
  func.func @transform_9(%arg0: i32, %arg1: i32) -> (i32, i32, i32) {
    %c0_i32 = arith.constant 0 : i32
    %c0_i32_0 = arith.constant 0 : i32
    %c0_i32_1 = arith.constant 0 : i32
    return %arg0, %c0_i32, %c0_i32_0 : i32, i32, i32
  }
  func.func @transform_10(%arg0: i32, %arg1: i32) -> (i32, i32, i32) {
    %c0_i32 = arith.constant 0 : i32
    %c0_i32_0 = arith.constant 0 : i32
    %c0_i32_1 = arith.constant 0 : i32
    return %arg0, %c0_i32, %c0_i32_0 : i32, i32, i32
  }
  func.func @transform_11(%arg0: i32, %arg1: i32) -> (i32, i32, i32) {
    %c0_i32 = arith.constant 0 : i32
    %c0_i32_0 = arith.constant 0 : i32
    %c0_i32_1 = arith.constant 0 : i32
    return %arg0, %c0_i32, %c0_i32_0 : i32, i32, i32
  }
  func.func @transform_12(%arg0: i32, %arg1: i32) -> (i32, i32, i32) {
    %c0_i32 = arith.constant 0 : i32
    %c0_i32_0 = arith.constant 0 : i32
    %c0_i32_1 = arith.constant 0 : i32
    return %arg0, %c0_i32, %c0_i32_0 : i32, i32, i32
  }
  func.func @transform_13(%arg0: i32, %arg1: i32) -> (i32, i32, i32) {
    %c0_i32 = arith.constant 0 : i32
    %c0_i32_0 = arith.constant 0 : i32
    %c0_i32_1 = arith.constant 0 : i32
    return %arg0, %c0_i32, %c0_i32_0 : i32, i32, i32
  }
  func.func @transform_14(%arg0: i32, %arg1: i32) -> (i32, i32, i32) {
    %c0_i32 = arith.constant 0 : i32
    %c0_i32_0 = arith.constant 0 : i32
    %c0_i32_1 = arith.constant 0 : i32
    return %arg0, %c0_i32, %c0_i32_0 : i32, i32, i32
  }
}

</mosaic_0001>

<bundles_post_ra>
// kernel: tpu_custom_call.1
= control target key start
LH: loop header
LB: loop body
LE: loop exit
PB: predicated region body
PF: predicated region fallthrough
CT: control target
= control target key end

     0   :  { %s2140_s29 = smov 0   ;;  %s2142_s30 = smov 0   ;;  %s2869_s0 = inlined_call_operand.vmem [shape: s32[2,1,256], index: 0, kind: input, shape index: {}]   ;;  %s2870_s1 = inlined_call_operand.vmem [shape: f32[21,1], index: 1, kind: input, shape index: {}]   ;;  %s2871_s2 = inlined_call_operand.vmem [shape: f32[2,21,256], index: 2, kind: input, shape index: {}]   ;;  %s2872_s3 = inlined_call_operand.vmem [shape: f32[2,21,256], index: 3, kind: input, shape index: {}]   ;;  %s2873_s4 = inlined_call_operand.vmem [shape: f32[2,21,256], index: 4, kind: input, shape index: {}]   ;;  %s2874_s5 = inlined_call_operand.vmem [shape: f32[2,21,256], index: 5, kind: input, shape index: {}]   ;;  %s2875_s6 = inlined_call_operand.vmem [shape: f32[2,21,256], index: 6, kind: input, shape index: {}]   ;;  %s2876_s7 = inlined_call_operand.vmem [shape: f32[2,21,256], index: 7, kind: input, shape index: {}]   ;;  %s2877_s8 = inlined_call_operand.vmem [shape: f32[2,1,1], index: 8, kind: output, shape index: {0}]   ;;  %s2878_s9 = inlined_call_operand.vmem [shape: f32[2,1,1], index: 9, kind: output, shape index: {1}]   ;;  %s2879_s10 = inlined_call_operand.vmem [shape: f32[2,1,1], index: 10, kind: output, shape index: {2}]   ;;  %s2880_s11 = inlined_call_operand.vmem [shape: f32[2,1,1], index: 11, kind: output, shape index: {3}]   ;;  %s2881_s12 = inlined_call_operand.vmem [shape: f32[2,1,1], index: 12, kind: output, shape index: {4}]   ;;  %s2882_s13 = inlined_call_operand.vmem [shape: f32[2,1,1], index: 13, kind: output, shape index: {5}]   ;;  %s2883_s14 = inlined_call_operand.vmem [shape: f32[2,1,1], index: 14, kind: output, shape index: {6}]  }
   0x1   :  { %s2144_s15 = smov 0  }
   0x2 LB: > { %s37_s16 = sadd.s32 1, %s2056_s30  ;;  %p1894_p0 = scmp.ge.s32.totalorder %s2060_s15, 1  ;;  %s2060_s15 = sphi %s2144_s15, %s25_s15   ;;  %s2056_s30 = sphi %s2142_s30, %s2940_s30   ;;  %s2052_s29 = sphi %s2140_s29, %s2939_s29  }
   0x3   : > { %p39_p1 = scmp.ge.s32.totalorder %s37_s16, 2  ;;  %p545_p2 = scmp.lt.s32.totalorder %s2060_s15, 3 }
   0x5   : > { %s2942_s16 = smov (%p39_p1, %s37_s16), 0  ;;  %p546_p3 = pnand %p1894_p0, %p545_p2 }
   0x7   : > { %549 = sbr.rel (%p546_p3) target bundleno = 369 (0x171), region = 52 }
   0xc   : > { %v770_v0 = vld [vmem:[%s2870_s1] sm:$0xff]  ;;  %v772_v1 = vld [vmem:[%s2870_s1 + $0x10] sm:$0x1f]  ;;  %v2062_v2 = vmov 0   ;;  %v771_v3 = vld [vmem:[%s2870_s1 + $0x8] sm:$0xff]  ;;  %p665_p4 = scmp.lt.s32.totalorder %s2052_s29, 1 }
   0xd   : > { %1938 = vset.pattern.permute.xlu0 %v2062_v2  ;;  %1939 = vset.pattern.permute.xlu1 %v2062_v2  ;;  %vm837_vm0 = vcmask 1044480   ;;  %v2063_v4 = vmov 1   ;;  %vm786_vm1 = vcmask 1040384   ;;  %vm1500_vm12 = vcmask 0  }
   0xe   : > { %817 = vperm.xlu0 %1938, %v770_v0   ;;  %827 = vperm.xlu1 %1939, %v772_v1   ;;  %s2944_s29 = smov (!%p665_p4, %s2052_s29), 1  ;;  %v785_v5 = vrot.slane %v2063_v4, 7 }
   0xf   : > { %s2170_s23 = smul.u32 48, %s2944_s29  ;;  %s1895_s25 = sshll.u32 %s2944_s29, 1 }
  0x10   : > { %v2230_v29 = vsel %vm786_vm1, 1, %v785_v5  ;;  %s671_s19 = scalar_lea.vmem %s2869_s0, %s1895_s25  ;;  %s753_s25 = scalar_lea.vmem %s2883_s14, %s2944_s29 }
  0x11   : > { %s681_s26 = scalar_lea.vmem %s2871_s2, %s2170_s23  ;;  %s691_s17 = scalar_lea.vmem %s2872_s3, %s2170_s23  ;;  %vm788_vm2 = vcmp.ne.s32.totalorder %v2230_v29, 0 }
  0x12   : > { %v2180_v6 = vld [vmem:[%s681_s26 + $0x20] sm:$0x1f]  ;;  %v2182_v7 = vld [vmem:[%s681_s26 + $0x28] sm:$0x1f]  ;;  %s701_s20 = scalar_lea.vmem %s2873_s4, %s2170_s23  ;;  %v2209_v20 = vld [vmem:[%s681_s26 + $0x10] sm:$0xff]  ;;  %s2221_s24 = scalar_lea.vmem %s2874_s5, %s2170_s23 }
  0x13   : > { %2902 = vst [vmem:[#allocation9_spill] sm:$0xff] %v2182_v7  ;;  %v2184_v8 = vld [vmem:[%s691_s17 + $0x20] sm:$0x1f]  ;;  %v2188_v10 = vld [vmem:[%s681_s26 + $0x8] sm:$0xff]  ;;  %v861_v11 = vsel %vm837_vm0, %v2180_v6, -inf  ;;  %v870_v12 = vsel %vm837_vm0, %v2182_v7, -inf  ;;  %s2290_s28 = scalar_lea.vmem %s2875_s6, %s2170_s23  ;;  %s2339_s22 = scalar_lea.vmem %s2876_s7, %s2170_s23 }
  0x14   : > { %2903 = vst [vmem:[#allocation10_spill] sm:$0xff] %v2184_v8  ;;  %v2186_v9 = vld [vmem:[%s681_s26] sm:$0xff]  ;;  %v983_v14 = vsel %vm837_vm0, %v2184_v8, -inf  ;;  %v871_v16 = vmax.f32 %v2188_v10, %v870_v12  ;;  %v2204_v17 = vld [vmem:[%s691_s17 + $0x8] sm:$0xff]  ;;  %v2211_v21 = vld [vmem:[%s681_s26 + $0x18] sm:$0xff]  ;;  %v2921_v7 = vmov 0.0  }
  0x15   : > { %v2194_v13 = vld [vmem:[%s691_s17] sm:$0xff]  ;;  %v862_v15 = vmax.f32 %v2186_v9, %v861_v11  ;;  %v2206_v18 = vld [vmem:[%s691_s17 + $0x28] sm:$0x1f]  ;;  %v2213_v22 = vld [vmem:[%s691_s17 + $0x10] sm:$0xff] }
  0x16   : > { %822 = vperm.xlu0 %1938, %v771_v3   ;;  %2904 = vst [vmem:[#allocation11_spill] sm:$0xff] %v2206_v18  ;;  %v984_v19 = vmax.f32 %v2194_v13, %v983_v14  ;;  %v992_v23 = vsel %vm837_vm0, %v2206_v18, -inf  ;;  %v872_v25 = vmax.f32 %v871_v16, %v2211_v21  ;;  %v2225_v26 = vld [vmem:[%s691_s17 + $0x18] sm:$0xff]  ;;  %v2232_v30 = vld [vmem:[%s701_s20 + $0x20] sm:$0x1f]  ;;  %v2239_v37 = vld [vmem:[%s701_s20 + $0x8] sm:$0xff] }
  0x17   : > { %v863_v24 = vmax.f32 %v862_v15, %v2209_v20  ;;  %v993_v28 = vmax.f32 %v2204_v17, %v992_v23  ;;  %2905 = vst [vmem:[#allocation12_spill] sm:$0xff] %v2232_v30  ;;  %v2234_v31 = vld [vmem:[%s701_s20 + $0x28] sm:$0x1f]  ;;  %v2237_v36 = vld [vmem:[%s701_s20] sm:$0xff]  ;;  %v2241_v38 = vld [vmem:[%s701_s20 + $0x10] sm:$0xff]  ;;  %v1085_v40 = vsel %vm837_vm0, %v2232_v30, -inf }
  0x18   : > { %v985_v27 = vmax.f32 %v984_v19, %v2213_v22  ;;  %2906 = vst [vmem:[#allocation13_spill] sm:$0xff] %v2234_v31  ;;  %v873_v33 = vrot.slane %v872_v25, 4  ;;  %v2243_v39 = vld [vmem:[%s701_s20 + $0x18] sm:$0xff]  ;;  %v1094_v41 = vsel %vm837_vm0, %v2234_v31, -inf  ;;  %v2250_v42 = vld [vmem:[%s2221_s24 + $0x20] sm:$0x1f]  ;;  %v1086_v50 = vmax.f32 %v2237_v36, %v1085_v40 }
  0x19   : > { %v864_v32 = vrot.slane %v863_v24, 4  ;;  %v994_v35 = vmax.f32 %v993_v28, %v2225_v26  ;;  %2907 = vst [vmem:[#allocation14_spill] sm:$0xff] %v2250_v42  ;;  %v2253_v47 = vld [vmem:[%s2221_s24] sm:$0xff]  ;;  %v2256_v48 = vld [vmem:[%s2221_s24 + $0x8] sm:$0xff]  ;;  %v1095_v51 = vmax.f32 %v2239_v37, %v1094_v41  ;;  %v1187_v52 = vsel %vm837_vm0, %v2250_v42, -inf  ;;  %v2268_v58 = vld [vmem:[%s2221_s24 + $0x10] sm:$0xff] }
  0x1a   : > { %v986_v34 = vrot.slane %v985_v27, 4  ;;  %v874_v44 = vmax.f32 %v872_v25, %v873_v33  ;;  %v2259_v49 = vld [vmem:[%s2221_s24 + $0x28] sm:$0x1f]  ;;  %v2271_v59 = vld [vmem:[%s2221_s24 + $0x18] sm:$0xff]  ;;  %v1087_v60 = vmax.f32 %v1086_v50, %v2241_v38  ;;  %v1188_v62 = vmax.f32 %v2253_v47, %v1187_v52  ;;  %v2331_v29 = vld [vmem:[%s2290_s28] sm:$0xff] }
  0x1b   : > { %v865_v43 = vmax.f32 %v863_v24, %v864_v32  ;;  %v995_v46 = vrot.slane %v994_v35, 4  ;;  %2908 = vst [vmem:[#allocation15_spill] sm:$0xff] %v2259_v49  ;;  %v1196_v53 = vsel %vm837_vm0, %v2259_v49, -inf  ;;  %v1096_v61 = vmax.f32 %v1095_v51, %v2243_v39 }
  0x1c   : > { %v987_v45 = vmax.f32 %v985_v27, %v986_v34  ;;  %v875_v55 = vrot.slane %v874_v44, 2  ;;  %v1197_v63 = vmax.f32 %v2256_v48, %v1196_v53  ;;  %v1088_v4 = vrot.slane %v1087_v60, 4 }
  0x1d   : > { %v866_v54 = vrot.slane %v865_v43, 2  ;;  %v996_v57 = vmax.f32 %v994_v35, %v995_v46  ;;  %v1097_v5 = vrot.slane %v1096_v61, 4  ;;  %v1189_v11 = vmax.f32 %v1188_v62, %v2268_v58 }
  0x1e   : > { %v988_v56 = vrot.slane %v987_v45, 2  ;;  %v876_v1 = vmax.f32 %v874_v44, %v875_v55  ;;  %v1198_v12 = vmax.f32 %v1197_v63, %v2271_v59  ;;  %v1089_v23 = vmax.f32 %v1087_v60, %v1088_v4 }
  0x1f   : > { %v867_v0 = vmax.f32 %v865_v43, %v866_v54  ;;  %v997_v3 = vrot.slane %v996_v57, 2  ;;  %v1098_v24 = vmax.f32 %v1096_v61, %v1097_v5  ;;  %v1190_v25 = vrot.slane %v1189_v11, 4  ;;  %v769_v61 = vld [vmem:[%s671_s19] sm:$0x3]  ;;  %s738_s19 = scalar_lea.vmem %s2878_s9, %s2944_s29 }
  0x20   : > { %v989_v2 = vmax.f32 %v987_v45, %v988_v56  ;;  %v877_v15 = vrot.slane %v876_v1, 1  ;;  %v1199_v27 = vrot.slane %v1198_v12, 4  ;;  %v1090_v35 = vrot.slane %v1089_v23, 2 }
  0x21   : > { %v868_v14 = vrot.slane %v867_v0, 1  ;;  %v998_v19 = vmax.f32 %v996_v57, %v997_v3  ;;  %v1099_v40 = vrot.slane %v1098_v24, 2  ;;  %v1191_v41 = vmax.f32 %v1189_v11, %v1190_v25 }
  0x22   : > { %v990_v16 = vrot.slane %v989_v2, 1  ;;  %v2282_v32 = vmax.f32 %v876_v1, %v877_v15  ;;  %v1200_v43 = vmax.f32 %v1198_v12, %v1199_v27  ;;  %v1091_v51 = vmax.f32 %v1089_v23, %v1090_v35  ;;  %v2359_v27 = vld [vmem:[%s2290_s28 + $0x8] sm:$0xff] }
  0x23   : > { %v2280_v28 = vmax.f32 %v867_v0, %v868_v14  ;;  %v999_v34 = vrot.slane %v998_v19, 1  ;;  %v1100_v52 = vmax.f32 %v1098_v24, %v1099_v40  ;;  %v1192_v53 = vrot.slane %v1191_v41, 2 }
  0x24   : > { %2909 = vst [vmem:[#allocation16_spill] sm:$0xff] %v2282_v32  ;;  %v2284_v33 = vmax.f32 %v989_v2, %v990_v16  ;;  %v880_v45 = vsub.f32 %v2188_v10, %v2282_v32  ;;  %v1201_v54 = vrot.slane %v1200_v43, 2  ;;  %v1092_v55 = vrot.slane %v1091_v51, 1 }
  0x25   : > { %v879_v44 = vsub.f32 %v2186_v9, %v2280_v28  ;;  %v2296_v46 = vmax.f32 %v998_v19, %v999_v34  ;;  %v1101_v56 = vrot.slane %v1100_v52, 1  ;;  %v1193_v57 = vmax.f32 %v1191_v41, %v1192_v53  ;;  %v2362_v34 = vld [vmem:[%s2290_s28 + $0x10] sm:$0xff] }
  0x26   : > { %v2300_v50 = vsub.f32 %v2194_v13, %v2284_v33  ;;  %v1202_v60 = vmax.f32 %v1200_v43, %v1201_v54  ;;  %v2309_v13 = vld [vmem:[%s2290_s28 + $0x20] sm:$0x1f]  ;;  %v887_v62 = vmul.f32 1.442695, %v880_v45  ;;  %vm782_vm3 = vcmp.ne.s32.totalorder %v769_v61, 21 }
  0x27   : > { %v885_v9 = vmul.f32 1.442695, %v879_v44  ;;  %v1002_v10 = vsub.f32 %v2204_v17, %v2296_v46  ;;  %2910 = vst [vmem:[#allocation17_spill] sm:$0xff] %v2309_v13  ;;  %v2312_v0 = vmax.f32 %v1091_v51, %v1092_v55  ;;  %v2314_v1 = vmax.f32 %v1100_v52, %v1101_v56  ;;  %vm2318_vm4 = vmand %vm782_vm3, %vm788_vm2  ;;  %v2375_v52 = vld [vmem:[%s2339_s22 + $0x20] sm:$0x1f] }
  0x28   : > { %v1007_v63 = vmul.f32 1.442695, %v2300_v50  ;;  %v758_v17 = vlaneseq  ;;  %v2911_v2 = vmov 0  ;;  %v1194_v4 = vrot.slane %v1193_v57, 1  ;;  %2918 = vst [vmem:[#allocation21_spill] sm:$0xff] %v2375_v52 }
  0x29   : > { %1940 = vpow2.f32 %v885_v9  ;;  %v2912_v2 = vsel %vm2318_vm4, 4294967295, %v2911_v2  ;;  %v1009_v3 = vmul.f32 1.442695, %v1002_v10  ;;  %v1203_v5 = vrot.slane %v1202_v60, 1  ;;  %v2386_v56 = vld [vmem:[%s2339_s22 + $0x28] sm:$0x1f] }
  0x2a   : > { %2913 = vst [vmem:[#allocation18_spill] sm:$0xff] %v2912_v2  ;;  %v790_v11 = vsel %vm2318_vm4, %v769_v61, 0  ;;  %v1103_v12 = vsub.f32 %v2237_v36, %v2312_v0  ;;  %v2328_v14 = vsub.f32 %v2239_v37, %v2314_v1  ;;  %v1289_v15 = vsel %vm837_vm0, %v2309_v13, -inf  ;;  %v2350_v37 = vld [vmem:[%s2290_s28 + $0x28] sm:$0x1f] }
  0x2b   : > { %v2341_v16 = vshrl.u32 %v758_v17, 7  ;;  %v2343_v19 = vperm.slane %v790_v11, 0  ;;  %v2345_v36 = vperm.slane %v790_v11, 1  ;;  %v2347_v23 = vmax.f32 %v1193_v57, %v1194_v4  ;;  %2914 = vst [vmem:[#allocation19_spill] sm:$0xff] %v2350_v37  ;;  %v2431_v4 = vld [vmem:[%s2339_s22 + $0x10] sm:$0xff] }
  0x2c   : > { %1942 = vpow2.f32 %v887_v62  ;;  %v1109_v24 = vmul.f32 1.442695, %v1103_v12  ;;  %v2352_v25 = vmax.f32 %v1202_v60, %v1203_v5  ;;  %v1290_v35 = vmax.f32 %v2331_v29, %v1289_v15  ;;  %2919 = vst [vmem:[#allocation22_spill] sm:$0xff] %v2386_v56  ;;  %v2402_v62 = vld [vmem:[%s2290_s28 + $0x18] sm:$0xff]  ;;  %s741_s28 = scalar_lea.vmem %s2879_s10, %s2944_s29 }
  0x2d   : > { %vm797_vm5 = vcmp.eq.s32.totalorder %v2341_v16, %v2343_v19  ;;  %vm798_vm6 = vcmp.eq.s32.totalorder %v2341_v16, %v2345_v36  ;;  %vm2367_vm7 = vcmp.lt.s32.totalorder %v758_v17, 256  ;;  %v2915_v41 = vmov 0  ;;  %v2420_v17 = vld [vmem:[%s2339_s22 + $0x8] sm:$0xff] }
  0x2e   : > { %v2916_v41 = vsel %vm2367_vm7, 4294967295, %v2915_v41  ;;  %1944 = vpow2.f32 %v1007_v63  ;;  %v1111_v43 = vmul.f32 1.442695, %v2328_v14  ;;  %v1298_v51 = vsel %vm837_vm0, %v2350_v37, -inf }
  0x2f   : > { %v2365_v40 = vpop.eup %1940  ;;  %2917 = vst [vmem:[#allocation20_spill] sm:$0xff] %v2916_v41  ;;  %v2894_v53 = vmov 0.0   ;;  %1946 = vpow2.f32 %v1009_v3  ;;  %v1205_v55 = vsub.f32 %v2253_v47, %v2347_v23  ;;  %v2399_v61 = vsub.f32 %v2256_v48, %v2352_v25  ;;  %v2405_v47 = vld [vmem:[%s2339_s22] sm:$0xff] }
  0x30   : > { %v2378_v54 = vsel %vm797_vm5, 1.0, %v2894_v53  ;;  %v2381_v9 = vsel %vm798_vm6, 1.0, %v2894_v53  ;;  %762 = vst.msk [vmem:[#allocation2] sm:$0x3] %vm2367_vm7, %v2894_v53  ;;  %1948 = vpow2.f32 %v1109_v24  ;;  %v1291_v63 = vmax.f32 %v1290_v35, %v2362_v34  ;;  %v2442_v35 = vld [vmem:[%s2339_s22 + $0x18] sm:$0xff]  ;;  %s735_s22 = scalar_lea.vmem %s2877_s8, %s2944_s29 }
  0x31   : > { %v2392_v57 = vmul.f32 %v2378_v54, %v879_v44  ;;  %v2395_v60 = vmul.f32 %v2381_v9, %v880_v45  ;;  %763 = vst.msk [vmem:[#allocation3] sm:$0x3] %vm2367_vm7, %v2894_v53  ;;  %v2412_v44 = vmul.f32 %v2378_v54, %v2300_v50  ;;  %v2415_v45 = vmul.f32 %v2381_v9, %v1002_v10 }
  0x32   : > { %v1299_v48 = vmax.f32 %v2359_v27, %v1298_v51  ;;  %764 = vst.msk [vmem:[#allocation4] sm:$0x3] %vm2367_vm7, %v2894_v53  ;;  %v2425_v3 = vpop.eup %1942  ;;  %1950 = vpow2.f32 %v1111_v43  ;;  %v2428_v50 = vmul.f32 %v2378_v54, %v1103_v12  ;;  %v1391_v10 = vsel %vm837_vm0, %v2375_v52, -inf }
  0x33   : > { %v1400_v5 = vsel %vm837_vm0, %v2386_v56, -inf  ;;  %765 = vst.msk [vmem:[#allocation5] sm:$0x3] %vm2367_vm7, %v2894_v53  ;;  %v1211_v11 = vmul.f32 1.442695, %v1205_v55  ;;  %v1292_v15 = vrot.slane %v1291_v63, 4  ;;  %v1392_v12 = vmax.f32 %v2405_v47, %v1391_v10 }
  0x34   : > { %v1300_v24 = vmax.f32 %v1299_v48, %v2402_v62  ;;  %766 = vst.msk [vmem:[#allocation6] sm:$0x3] %vm2367_vm7, %v2894_v53  ;;  %v2448_v43 = vpop.eup %1944  ;;  %v1213_v51 = vmul.f32 1.442695, %v2399_v61  ;;  %v1401_v56 = vmax.f32 %v2420_v17, %v1400_v5  ;;  %v793_v48 = vadd.s32 8, %v2341_v16 }
  0x35   : > { %767 = vst.msk [vmem:[#allocation7] sm:$0x3] %vm2367_vm7, %v2894_v53  ;;  %v881_v52 = vsub.f32 %v2209_v20, %v2280_v28  ;;  %v2458_v10 = vpop.eup %1946  ;;  %v1293_v37 = vmax.f32 %v1291_v63, %v1292_v15  ;;  %v1393_v49 = vmax.f32 %v1392_v12, %v2431_v4  ;;  %v882_v5 = vsub.f32 %v2211_v21, %v2282_v32 }
  0x36   : > { %v1301_v13 = vrot.slane %v1300_v24, 4  ;;  %768 = vst.msk [vmem:[#allocation8] sm:$0x3] %vm2367_vm7, %v2894_v53  ;;  %v2466_v42 = vpop.eup %1948  ;;  %v2470_v2 = vmul.f32 %v2381_v9, %v2328_v14  ;;  %v2473_v20 = vmul.f32 %v2378_v54, %v1205_v55  ;;  %v1402_v63 = vmax.f32 %v1401_v56, %v2442_v35 }
  0x37   : > { %v889_v15 = vmul.f32 1.442695, %v881_v52  ;;  %v1294_v12 = vrot.slane %v1293_v37, 2  ;;  %v1394_v30 = vrot.slane %v1393_v49, 4  ;;  %vm799_vm8 = vcmp.eq.s32.totalorder %v793_v48, %v2343_v19 }
  0x38   : > { %v1302_v31 = vmax.f32 %v1300_v24, %v1301_v13  ;;  %v2477_v53 = vpop.eup %1950  ;;  %1952 = vpow2.f32 %v1211_v11  ;;  %v1403_v21 = vrot.slane %v1402_v63, 4  ;;  %vm800_vm9 = vcmp.eq.s32.totalorder %v793_v48, %v2345_v36 }
  0x39   : > { %2920 = vst [vmem:[#allocation23_spill] sm:$0xff] %v2477_v53  ;;  %v891_v41 = vmul.f32 1.442695, %v882_v5  ;;  %1954 = vpow2.f32 %v1213_v51  ;;  %v1295_v14 = vmax.f32 %v1293_v37, %v1294_v12  ;;  %v1395_v55 = vmax.f32 %v1393_v49, %v1394_v30 }
  0x3a   : > { %v1303_v18 = vrot.slane %v1302_v31, 2  ;;  %v1404_v8 = vmax.f32 %v1402_v63, %v1403_v21  ;;  %v2481_v56 = vsel %vm799_vm8, 1.0, %v2921_v7  ;;  %1956 = vpow2.f32 %v889_v15 }
  0x3b   : > { %v1003_v13 = vsub.f32 %v2213_v22, %v2284_v33  ;;  %v1296_v24 = vrot.slane %v1295_v14, 1  ;;  %v1396_v53 = vrot.slane %v1395_v55, 2  ;;  %v2486_v11 = vsel %vm800_vm9, 1.0, %v2921_v7 }
  0x3c   : > { %v1304_v32 = vmax.f32 %v1302_v31, %v1303_v18  ;;  %v1405_v48 = vrot.slane %v1404_v8, 2  ;;  %1958 = vpow2.f32 %v891_v41  ;;  %v1004_v37 = vsub.f32 %v2225_v26, %v2296_v46 }
  0x3d   : > { %v1011_v30 = vmul.f32 1.442695, %v1003_v13  ;;  %v2490_v49 = vmax.f32 %v1295_v14, %v1296_v24  ;;  %v1397_v63 = vmax.f32 %v1395_v55, %v1396_v53  ;;  %v921_v15 = vmul.f32 %v2481_v56, %v881_v52 }
  0x3e   : > { %v1305_v51 = vrot.slane %v1304_v32, 1  ;;  %v2493_v12 = vpop.eup %1952  ;;  %v1406_v22 = vmax.f32 %v1404_v8, %v1405_v48  ;;  %v922_v18 = vmul.f32 %v2486_v11, %v882_v5  ;;  %v1013_v31 = vmul.f32 1.442695, %v1004_v37 }
  0x3f   : > { %1960 = vpow2.f32 %v1011_v30  ;;  %v2496_v21 = vpop.eup %1954  ;;  %v1307_v26 = vsub.f32 %v2331_v29, %v2490_v49  ;;  %v1398_v14 = vrot.slane %v1397_v63, 1  ;;  %v1043_v24 = vmul.f32 %v2481_v56, %v1003_v13 }
  0x40   : > { %v2498_v41 = vmax.f32 %v1304_v32, %v1305_v51  ;;  %v1957_v53 = vpop.eup %1956  ;;  %v2505_v52 = vmul.f32 %v2381_v9, %v2399_v61  ;;  %v1407_v8 = vrot.slane %v1406_v22, 1  ;;  %1962 = vpow2.f32 %v1013_v31 }
  0x41   : > { %v1044_v5 = vmul.f32 %v2486_v11, %v1004_v37  ;;  %v1313_v32 = vmul.f32 1.442695, %v1307_v26  ;;  %v2510_v48 = vmax.f32 %v1397_v63, %v1398_v14  ;;  %v2513_v29 = vadd.f32 %v921_v15, %v2392_v57 }
  0x42   : > { %v1308_v55 = vsub.f32 %v2359_v27, %v2498_v41  ;;  %v1959_v30 = vpop.eup %1958  ;;  %v2515_v13 = vmax.f32 %v1406_v22, %v1407_v8  ;;  %v2518_v51 = vadd.f32 %v922_v18, %v2395_v60  ;;  %v1105_v61 = vsub.f32 %v2241_v38, %v2312_v0 }
  0x43   : > { %v1106_v37 = vsub.f32 %v2243_v39, %v2314_v1  ;;  %v1409_v27 = vsub.f32 %v2405_v47, %v2510_v48  ;;  %v2527_v63 = vadd.f32 %v1957_v53, %v2365_v40  ;;  %v2530_v57 = vadd.f32 %v1043_v24, %v2412_v44 }
  0x44   : > { %v1315_v31 = vmul.f32 1.442695, %v1308_v55  ;;  %1964 = vpow2.f32 %v1313_v32  ;;  %v1410_v60 = vsub.f32 %v2420_v17, %v2515_v13  ;;  %v2535_v38 = vadd.f32 %v1044_v5, %v2415_v45 }
  0x45   : > { %v1961_v15 = vpop.eup %1960  ;;  %v1113_v22 = vmul.f32 1.442695, %v1105_v61  ;;  %v1347_v39 = vmul.f32 %v2378_v54, %v1307_v26  ;;  %v1415_v18 = vmul.f32 1.442695, %v1409_v27  ;;  %v2539_v47 = vadd.f32 %v1959_v30, %v2425_v3 }
  0x46   : > { %1966 = vpow2.f32 %v1315_v31  ;;  %v1963_v40 = vpop.eup %1962  ;;  %v1348_v44 = vmul.f32 %v2381_v9, %v1308_v55  ;;  %v1115_v14 = vmul.f32 1.442695, %v1106_v37  ;;  %v1145_v24 = vmul.f32 %v2481_v56, %v1105_v61 }
  0x47   : > { %1968 = vpow2.f32 %v1113_v22  ;;  %v1417_v53 = vmul.f32 1.442695, %v1410_v60  ;;  %v1449_v17 = vmul.f32 %v2378_v54, %v1409_v27  ;;  %v2545_v45 = vadd.f32 %v1961_v15, %v2448_v43 }
  0x48   : > { %v1207_v26 = vsub.f32 %v2268_v58, %v2347_v23  ;;  %v1450_v8 = vmul.f32 %v2381_v9, %v1410_v60  ;;  %v1146_v3 = vmul.f32 %v2486_v11, %v1106_v37  ;;  %v1208_v5 = vsub.f32 %v2271_v59, %v2352_v25 }
  0x49   : > { %v1309_v55 = vsub.f32 %v2362_v34, %v2490_v49  ;;  %1970 = vpow2.f32 %v1415_v18  ;;  %v2556_v32 = vadd.f32 %v1963_v40, %v2458_v10  ;;  %v1310_v43 = vsub.f32 %v2402_v62, %v2498_v41 }
  0x4a   : > { %v1215_v30 = vmul.f32 1.442695, %v1207_v26  ;;  %v2560_v61 = vpop.eup %1964  ;;  %1972 = vpow2.f32 %v1115_v14  ;;  %v1217_v58 = vmul.f32 1.442695, %v1208_v5  ;;  %v1247_v37 = vmul.f32 %v2481_v56, %v1207_v26 }
  0x4b   : > { %v1349_v31 = vmul.f32 %v2481_v56, %v1309_v55  ;;  %v2567_v34 = vadd.f32 %v1145_v24, %v2428_v50  ;;  %v1248_v10 = vmul.f32 %v2486_v11, %v1208_v5  ;;  %v1317_v27 = vmul.f32 1.442695, %v1309_v55 }
  0x4c   : > { %v2564_v59 = vpop.eup %1966  ;;  %v1350_v15 = vmul.f32 %v2486_v11, %v1310_v43  ;;  %1974 = vpow2.f32 %v1215_v30  ;;  %v1319_v62 = vmul.f32 1.442695, %v1310_v43  ;;  %v1411_v18 = vsub.f32 %v2431_v4, %v2510_v48 }
  0x4d   : > { %v1969_v60 = vpop.eup %1968  ;;  %v2571_v22 = vadd.f32 %v1349_v31, %v1347_v39  ;;  %1976 = vpow2.f32 %v1417_v53  ;;  %v2576_v40 = vadd.f32 %v1146_v3, %v2470_v2  ;;  %v1412_v50 = vsub.f32 %v2442_v35, %v2515_v13 }
  0x4e   : > { %v2578_v14 = vadd.f32 %v1350_v15, %v1348_v44  ;;  %1978 = vpow2.f32 %v1217_v58  ;;  %v2583_v26 = vadd.f32 %v1247_v37, %v2473_v20  ;;  %v1451_v39 = vmul.f32 %v2481_v56, %v1411_v18 }
  0x4f   : > { %v794_v5 = vadd.s32 16, %v2341_v16  ;;  %v2587_v55 = vpop.eup %1970  ;;  %v2590_v4 = vadd.f32 %v1969_v60, %v2466_v42  ;;  %v2593_v2 = vadd.f32 %v1248_v10, %v2505_v52  ;;  %1980 = vpow2.f32 %v1317_v27  ;;  %v2924_v10 = vld [vmem:[#allocation16_spill] sm:$0xff]  ;;  %v2925_v27 = vld [vmem:[#allocation9_spill] sm:$0xff] }
  0x50   : > { %v1452_v35 = vmul.f32 %v2486_v11, %v1412_v50  ;;  %v1973_v44 = vpop.eup %1972  ;;  %1982 = vpow2.f32 %v1319_v62  ;;  %v1419_v53 = vmul.f32 1.442695, %v1411_v18  ;;  %v2596_v20 = vadd.f32 %v1451_v39, %v1449_v17 }
  0x51   : > { %vm801_vm10 = vcmp.eq.s32.totalorder %v794_v5, %v2343_v19  ;;  %v1421_v16 = vmul.f32 1.442695, %v1412_v50  ;;  %vm802_vm11 = vcmp.eq.s32.totalorder %v794_v5, %v2345_v36  ;;  %v883_v17 = vsub.f32 %v2180_v6, %v2280_v28 }
  0x52   : > { %v2599_v30 = vadd.f32 %v1452_v35, %v1450_v8  ;;  %v2603_v42 = vsel %vm801_vm10, 1.0, %v2921_v7  ;;  %v1975_v52 = vpop.eup %1974  ;;  %v2608_v37 = vsel %vm802_vm11, 1.0, %v2921_v7  ;;  %v2923_v8 = vld [vmem:[#allocation23_spill] sm:$0xff]  ;;  %v884_v15 = vsub.f32 %v2925_v27, %v2924_v10 }
  0x53   : > { %v2612_v19 = vpop.eup %1976  ;;  %v2615_v31 = vadd.f32 %v1973_v44, %v2923_v8  ;;  %1984 = vpow2.f32 %v1419_v53  ;;  %v893_v62 = vmul.f32 1.442695, %v883_v17  ;;  %v923_v6 = vmul.f32 %v2603_v42, %v883_v17  ;;  %v2927_v35 = vld [vmem:[#allocation11_spill] sm:$0xff] }
  0x54   : > { %2922 = vst [vmem:[#allocation24_spill] sm:$0xff] %v2599_v30  ;;  %v2627_v18 = vadd.f32 %v1975_v52, %v2493_v12  ;;  %1986 = vpow2.f32 %v1421_v16  ;;  %v895_v50 = vmul.f32 1.442695, %v884_v15  ;;  %v1006_v44 = vsub.f32 %v2927_v35, %v2296_v46 }
  0x55   : > { %1988 = vpow2.f32 %v893_v62 }
  0x56   : > { %1990 = vpow2.f32 %v895_v50  ;;  %v1017_v46 = vmul.f32 1.442695, %v1006_v44 }
  0x80   : > { %v818_v24 = vpop.permute.xlu0 %817  ;;  %v828_v3 = vpop.permute.xlu1 %827 }
  0x81   : > { %v830_v43 = vmul.f32 %v2378_v54, %v818_v24  ;;  %v831_v58 = vmul.f32 %v2381_v9, %v818_v24  ;;  %v834_v36 = vmul.f32 %v2603_v42, %v828_v3  ;;  %v2926_v54 = vld [vmem:[#allocation10_spill] sm:$0xff]  ;;  %v1979_v9 = vpop.eup %1978  ;;  %v835_v7 = vmul.f32 %v2608_v37, %v828_v3 }
  0x82   : > { %v1005_v60 = vsub.f32 %v2926_v54, %v2284_v33  ;;  %v2624_v28 = vpop.eup %1980  ;;  %v924_v24 = vmul.f32 %v2608_v37, %v884_v15  ;;  %v926_v33 = vsel %vm837_vm0, %v923_v6, 0.0 }
  0x83   : > { %v2630_v39 = vpop.eup %1982  ;;  %v838_v12 = vsel %vm837_vm0, %v834_v36, 0.0  ;;  %v847_v16 = vsel %vm837_vm0, %v835_v7, 0.0  ;;  %v927_v52 = vadd.f32 %v926_v33, %v2513_v29  ;;  %v1046_v7 = vmul.f32 %v2608_v37, %v1006_v44 }
  0x84   : > { %v1015_v53 = vmul.f32 1.442695, %v1005_v60  ;;  %v935_v8 = vsel %vm837_vm0, %v924_v24, 0.0  ;;  %v2642_v54 = vpop.eup %1984  ;;  %v1045_v36 = vmul.f32 %v2603_v42, %v1005_v60 }
  0x85   : > { %v936_v15 = vadd.f32 %v935_v8, %v2518_v51  ;;  %v2649_v62 = vpop.eup %1986  ;;  %v1057_v24 = vsel %vm837_vm0, %v1046_v7, 0.0 }
  0x86   : > { %1992 = vpow2.f32 %v1015_v53  ;;  %v1048_v51 = vsel %vm837_vm0, %v1045_v36, 0.0 }
  0x87   : > { %v937_v50 = vrot.slane %v936_v15, 4  ;;  %1994 = vpow2.f32 %v1017_v46 }
  0x88   : > { %v823_v5 = vpop.permute.xlu0 %822 }
  0x89   : > { %v832_v3 = vmul.f32 %v2481_v56, %v823_v5  ;;  %v833_v17 = vmul.f32 %v2486_v11, %v823_v5  ;;  %v2645_v56 = vadd.f32 %v1979_v9, %v2496_v21  ;;  %v928_v11 = vrot.slane %v927_v52, 4  ;;  %v2928_v21 = vld [vmem:[#allocation12_spill] sm:$0xff] }
  0x8a   : > { %v2655_v9 = vsub.f32 %v2928_v21, %v2312_v0  ;;  %v938_v44 = vadd.f32 %v937_v50, %v936_v15 }
  0x8b   : > { %v836_v10 = vadd.f32 %v832_v3, %v830_v43  ;;  %v846_v27 = vadd.f32 %v833_v17, %v831_v58  ;;  %v1989_v43 = vpop.eup %1988  ;;  %v929_v58 = vadd.f32 %v928_v11, %v927_v52 }
  0x8c   : > { %v1991_v5 = vpop.eup %1990  ;;  %v898_v35 = vsel %vm837_vm0, %v1989_v43, 0.0  ;;  %v939_v0 = vrot.slane %v938_v44, 2 }
  0x8d   : > { %v839_v29 = vadd.f32 %v838_v12, %v836_v10  ;;  %v848_v6 = vadd.f32 %v847_v16, %v846_v27  ;;  %v1993_v53 = vpop.eup %1992  ;;  %v899_v3 = vadd.f32 %v898_v35, %v2527_v63  ;;  %v907_v17 = vsel %vm837_vm0, %v1991_v5, 0.0 }
  0x8e   : > { %v930_v12 = vrot.slane %v929_v58, 2  ;;  %v1049_v16 = vadd.f32 %v1048_v51, %v2530_v57  ;;  %v908_v10 = vadd.f32 %v907_v17, %v2539_v47  ;;  %v1020_v11 = vsel %vm837_vm0, %v1993_v53, 0.0  ;;  %v1995_v7 = vpop.eup %1994  ;;  %v2929_v51 = vld [vmem:[#allocation13_spill] sm:$0xff] }
  0x8f   : > { %v840_v60 = vrot.slane %v839_v29, 4  ;;  %v849_v33 = vrot.slane %v848_v6, 4  ;;  %v900_v27 = vrot.slane %v899_v3, 4  ;;  %v940_v63 = vadd.f32 %v939_v0, %v938_v44 }
  0x90   : > { %v931_v46 = vadd.f32 %v930_v12, %v929_v58  ;;  %v1050_v36 = vrot.slane %v1049_v16, 4  ;;  %v909_v43 = vrot.slane %v908_v10, 4  ;;  %v1021_v35 = vadd.f32 %v1020_v11, %v2545_v45 }
  0x91   : > { %v841_v52 = vadd.f32 %v840_v60, %v839_v29  ;;  %v850_v8 = vadd.f32 %v849_v33, %v848_v6  ;;  %v901_v21 = vadd.f32 %v900_v27, %v899_v3  ;;  %v1029_v57 = vsel %vm837_vm0, %v1995_v7, 0.0 }
  0x92   : > { %v932_v5 = vrot.slane %v931_v46, 1  ;;  %v910_v47 = vadd.f32 %v909_v43, %v908_v10  ;;  %v1108_v58 = vsub.f32 %v2929_v51, %v2314_v1  ;;  %v941_v33 = vrot.slane %v940_v63, 1 }
  0x93   : > { %v842_v15 = vrot.slane %v841_v52, 2  ;;  %v851_v50 = vrot.slane %v850_v8, 2  ;;  %v902_v60 = vrot.slane %v901_v21, 2  ;;  %v1022_v53 = vrot.slane %v1021_v35, 4 }
  0x94   : > { %v1030_v17 = vadd.f32 %v1029_v57, %v2556_v32  ;;  %v911_v44 = vrot.slane %v910_v47, 2  ;;  %v2668_v3 = vadd.f32 %v932_v5, %v931_v46  ;;  %v1051_v11 = vadd.f32 %v1050_v36, %v1049_v16 }
  0x95   : > { %v843_v29 = vadd.f32 %v842_v15, %v841_v52  ;;  %v852_v6 = vadd.f32 %v851_v50, %v850_v8  ;;  %v903_v0 = vadd.f32 %v902_v60, %v901_v21  ;;  %v1023_v45 = vadd.f32 %v1022_v53, %v1021_v35  ;;  %v967_v35 = vld [vmem:[#allocation8] sm:$0x3] }
  0x96   : > { %v1031_v27 = vrot.slane %v1030_v17, 4  ;;  %v912_v10 = vadd.f32 %v911_v44, %v910_v47  ;;  %v1058_v1 = vadd.f32 %v1057_v24, %v2535_v38  ;;  %v1052_v32 = vrot.slane %v1051_v11, 2 }
  0x97   : > { %v844_v12 = vrot.slane %v843_v29, 1  ;;  %v853_v30 = vrot.slane %v852_v6, 1  ;;  %v904_v7 = vrot.slane %v903_v0, 1  ;;  %v1024_v15 = vrot.slane %v1023_v45, 2 }
  0x98   : > { %v1032_v50 = vadd.f32 %v1031_v27, %v1030_v17  ;;  %v913_v43 = vrot.slane %v912_v10, 1  ;;  %v1059_v46 = vrot.slane %v1058_v1, 4  ;;  %v1117_v21 = vmul.f32 1.442695, %v2655_v9 }
  0x99   : > { %v2670_v52 = vadd.f32 %v844_v12, %v843_v29  ;;  %v2672_v8 = vadd.f32 %v853_v30, %v852_v6  ;;  %v905_v5 = vadd.f32 %v904_v7, %v903_v0  ;;  %v1025_v16 = vadd.f32 %v1024_v15, %v1023_v45  ;;  %v2931_v7 = vld [vmem:[#allocation14_spill] sm:$0xff] }
  0x9a   : > { %v1033_v36 = vrot.slane %v1032_v50, 2  ;;  %v1053_v29 = vadd.f32 %v1052_v32, %v1051_v11  ;;  %v914_v30 = vadd.f32 %v913_v43, %v912_v10  ;;  %v1060_v38 = vadd.f32 %v1059_v46, %v1058_v1 }
  0x9b   : > { %v970_v57 = vrot.slane %v2672_v8, 7  ;;  %1996 = vpow2.f32 %v1117_v21  ;;  %v1026_v51 = vrot.slane %v1025_v16, 1  ;;  %v942_v53 = vadd.f32 %v941_v33, %v940_v63  ;;  %v2933_v33 = vld [vmem:[#allocation15_spill] sm:$0xff] }
  0x9c   : > { %1998 = vlog2.f32 %v905_v5  ;;  %v1034_v60 = vadd.f32 %v1033_v36, %v1032_v50  ;;  %v1061_v12 = vrot.slane %v1060_v38, 2  ;;  %v1119_v45 = vmul.f32 1.442695, %v1108_v58 }
  0x9d   : > { %v971_v6 = vsel %vm786_vm1, %v2670_v52, %v970_v57  ;;  %2000 = vlog2.f32 %v914_v30  ;;  %v1027_v44 = vadd.f32 %v1026_v51, %v1025_v16  ;;  %v1147_v27 = vmul.f32 %v2603_v42, %v2655_v9 }
  0x9e   : > { %v973_v47 = vsel %vm2318_vm4, %v971_v6, 0.0  ;;  %v1035_v0 = vrot.slane %v1034_v60, 1  ;;  %v1054_v11 = vrot.slane %v1053_v29, 1  ;;  %v1062_v10 = vadd.f32 %v1061_v12, %v1060_v38 }
  0x9f   : > { %v974_v17 = vadd.f32 %v973_v47, %v967_v35  ;;  %v1148_v1 = vmul.f32 %v2608_v37, %v1108_v58  ;;  %v1209_v15 = vsub.f32 %v2931_v7, %v2347_v23  ;;  %2002 = vlog2.f32 %v1027_v44 }
  0xa0   : > { %v1036_v50 = vadd.f32 %v1035_v0, %v1034_v60  ;;  %v1150_v63 = vsel %vm837_vm0, %v1147_v27, 0.0  ;;  %v1210_v43 = vsub.f32 %v2933_v33, %v2352_v25  ;;  %v1063_v46 = vrot.slane %v1062_v10, 1 }
  0xa1   : > { %975 = vst.msk [vmem:[#allocation8] sm:$0x3] %vm2367_vm7, %v974_v17  ;;  %v1997_v57 = vpop.eup %1996  ;;  %2004 = vpow2.f32 %v1119_v45  ;;  %v1151_v9 = vadd.f32 %v1150_v63, %v2567_v34  ;;  %v1159_v58 = vsel %vm837_vm0, %v1148_v1, 0.0  ;;  %v1219_v35 = vmul.f32 1.442695, %v1209_v15 }
  0xa2   : > { %v1999_v21 = vpop.eup %1998  ;;  %2006 = vlog2.f32 %v1036_v50  ;;  %v1122_v23 = vsel %vm837_vm0, %v1997_v57, 0.0  ;;  %v1160_v5 = vadd.f32 %v1159_v58, %v2576_v40  ;;  %v2697_v36 = vadd.f32 %v2624_v28, %v2560_v61 }
  0xa3   : > { %v2001_v16 = vpop.eup %2000  ;;  %v916_v25 = vmul.f32 0.6931472, %v1999_v21  ;;  %v1123_v30 = vadd.f32 %v1122_v23, %v2590_v4  ;;  %v1152_v6 = vrot.slane %v1151_v9, 4  ;;  %2008 = vpow2.f32 %v1219_v35 }
  0xa4   : > { %v918_v38 = vmul.f32 0.6931472, %v2001_v16  ;;  %v1161_v34 = vrot.slane %v1160_v5, 4  ;;  %v1221_v47 = vmul.f32 1.442695, %v1210_v43  ;;  %v1055_v51 = vadd.f32 %v1054_v11, %v1053_v29 }
  0xa5   : > { %v1124_v60 = vrot.slane %v1123_v30, 4  ;;  %v1153_v17 = vadd.f32 %v1152_v6, %v1151_v9  ;;  %v1249_v12 = vmul.f32 %v2603_v42, %v1209_v15  ;;  %v2003_v40 = vpop.eup %2002  ;;  %v943_v44 = vsub.f32 %v2668_v3, %v916_v25 }
  0xa6   : > { %v944_v0 = vsub.f32 %v942_v53, %v918_v38  ;;  %v1064_v45 = vadd.f32 %v1063_v46, %v1062_v10  ;;  %v1162_v61 = vadd.f32 %v1161_v34, %v1160_v5  ;;  %v1038_v27 = vmul.f32 0.6931472, %v2003_v40 }
  0xa7   : > { %v2005_v28 = vpop.eup %2004  ;;  %v1125_v1 = vadd.f32 %v1124_v60, %v1123_v30  ;;  %v1154_v4 = vrot.slane %v1153_v17, 2  ;;  %2010 = vpow2.f32 %v1221_v47  ;;  %v2704_v50 = vadd.f32 %v2630_v39, %v2564_v59 }
  0xa8   : > { %v2007_v7 = vpop.eup %2006  ;;  %v946_v29 = vmul.f32 %v944_v0, %v2672_v8  ;;  %v1131_v11 = vsel %vm837_vm0, %v2005_v28, 0.0  ;;  %v1163_v15 = vrot.slane %v1162_v61, 2  ;;  %v1252_v10 = vsel %vm837_vm0, %v1249_v12, 0.0 }
  0xa9   : > { %v1040_v63 = vmul.f32 0.6931472, %v2007_v7  ;;  %v1126_v3 = vrot.slane %v1125_v1, 2  ;;  %v1132_v53 = vadd.f32 %v1131_v11, %v2615_v31  ;;  %v2009_v33 = vpop.eup %2008  ;;  %v2712_v57 = vadd.f32 %v2642_v54, %v2587_v55 }
  0xaa   : > { %v945_v46 = vmul.f32 %v943_v44, %v2670_v52  ;;  %v949_v59 = vrot.slane %v946_v29, 7  ;;  %v1065_v39 = vsub.f32 %v1055_v51, %v1038_v27  ;;  %v1155_v23 = vadd.f32 %v1154_v4, %v1153_v17 }
  0xab   : > { %v1066_v9 = vsub.f32 %v1064_v45, %v1040_v63  ;;  %v1127_v58 = vadd.f32 %v1126_v3, %v1125_v1  ;;  %v1133_v21 = vrot.slane %v1132_v53, 4  ;;  %v1224_v35 = vsel %vm837_vm0, %v2009_v33, 0.0  ;;  %v2935_v3 = vld [vmem:[#allocation19_spill] sm:$0xff] }
  0xac   : > { %v950_v5 = vsel %vm786_vm1, %v945_v46, %v949_v59  ;;  %v1250_v31 = vmul.f32 %v2608_v37, %v1210_v43  ;;  %v1253_v16 = vadd.f32 %v1252_v10, %v2583_v26  ;;  %v1164_v6 = vadd.f32 %v1163_v15, %v1162_v61 }
  0xad   : > { %v2011_v25 = vpop.eup %2010  ;;  %v952_v55 = vsel %vm2318_vm4, %v950_v5, 0.0  ;;  %v1128_v54 = vrot.slane %v1127_v58, 1  ;;  %v1134_v30 = vadd.f32 %v1133_v21, %v1132_v53  ;;  %v2723_v38 = vadd.f32 %v2649_v62, %v2612_v19 }
  0xae   : > { %v953_v34 = vmul.f32 1.442695, %v952_v55  ;;  %v1067_v47 = vmul.f32 %v1065_v39, %v2670_v52  ;;  %v1068_v51 = vmul.f32 %v1066_v9, %v2672_v8  ;;  %v1156_v17 = vrot.slane %v1155_v23, 1 }
  0xaf   : > { %v1129_v60 = vadd.f32 %v1128_v54, %v1127_v58  ;;  %v1135_v43 = vrot.slane %v1134_v30, 2  ;;  %v1225_v26 = vadd.f32 %v1224_v35, %v2627_v18  ;;  %v1233_v12 = vsel %vm837_vm0, %v2011_v25, 0.0  ;;  %v2934_v18 = vld [vmem:[#allocation17_spill] sm:$0xff] }
  0xb0   : > { %2012 = vpow2.f32 %v953_v34  ;;  %v1254_v40 = vrot.slane %v1253_v16, 4  ;;  %v1261_v44 = vsel %vm837_vm0, %v1250_v31, 0.0  ;;  %v1165_v19 = vrot.slane %v1164_v6, 1 }
  0xb1   : > { %v1136_v0 = vadd.f32 %v1135_v43, %v1134_v30  ;;  %2014 = vlog2.f32 %v1129_v60  ;;  %v1226_v62 = vrot.slane %v1225_v26, 4  ;;  %v1071_v45 = vrot.slane %v1068_v51, 7 }
  0xb2   : > { %v1234_v61 = vadd.f32 %v1233_v12, %v2645_v56  ;;  %v1255_v28 = vadd.f32 %v1254_v40, %v1253_v16  ;;  %v1262_v27 = vadd.f32 %v1261_v44, %v2593_v2  ;;  %v1157_v4 = vadd.f32 %v1156_v17, %v1155_v23 }
  0xb3   : > { %v1137_v1 = vrot.slane %v1136_v0, 1  ;;  %v1227_v7 = vadd.f32 %v1226_v62, %v1225_v26  ;;  %v1311_v29 = vsub.f32 %v2934_v18, %v2490_v49  ;;  %v1312_v53 = vsub.f32 %v2935_v3, %v2498_v41 }
  0xb4   : > { %v1235_v11 = vrot.slane %v1234_v61, 4  ;;  %v1256_v15 = vrot.slane %v1255_v28, 2  ;;  %v1263_v63 = vrot.slane %v1262_v27, 4  ;;  %v2738_v2 = vsel %vm786_vm1, %v1067_v47, %v1071_v45 }
  0xb5   : > { %v1138_v10 = vadd.f32 %v1137_v1, %v1136_v0  ;;  %v1228_v33 = vrot.slane %v1227_v7, 2  ;;  %v1321_v46 = vmul.f32 1.442695, %v1311_v29  ;;  %v1351_v56 = vmul.f32 %v2603_v42, %v1311_v29  ;;  %v2937_v29 = vld [vmem:[#allocation22_spill] sm:$0xff] }
  0xb6   : > { %v2013_v59 = vpop.eup %2012  ;;  %v1236_v39 = vadd.f32 %v1235_v11, %v1234_v61  ;;  %v1257_v9 = vadd.f32 %v1256_v15, %v1255_v28  ;;  %v1264_v58 = vadd.f32 %v1263_v63, %v1262_v27  ;;  %v1323_v5 = vmul.f32 1.442695, %v1312_v53 }
  0xb7   : > { %v2015_v21 = vpop.eup %2014  ;;  %v955_v49 = vsub.f32 1.0, %v2013_v59  ;;  %2016 = vlog2.f32 %v1138_v10  ;;  %v1229_v23 = vadd.f32 %v1228_v33, %v1227_v7  ;;  %v1352_v16 = vmul.f32 %v2608_v37, %v1312_v53 }
  0xb8   : > { %v1140_v35 = vmul.f32 0.6931472, %v2015_v21  ;;  %v1237_v31 = vrot.slane %v1236_v39, 2  ;;  %v1265_v41 = vrot.slane %v1264_v58, 2  ;;  %v1258_v54 = vrot.slane %v1257_v9, 1 }
  0xb9   : > { %v1230_v25 = vrot.slane %v1229_v23, 1  ;;  %2018 = vpow2.f32 %v1321_v46  ;;  %v1354_v30 = vsel %vm837_vm0, %v1351_v56, 0.0  ;;  %v2742_v34 = vmul.f32 0.5, %v952_v55 }
  0xba   : > { %v1166_v47 = vadd.f32 %v1165_v19, %v1164_v6  ;;  %v1167_v51 = vsub.f32 %v1157_v4, %v1140_v35  ;;  %v1238_v60 = vadd.f32 %v1237_v31, %v1236_v39  ;;  %v1266_v17 = vadd.f32 %v1265_v41, %v1264_v58 }
  0xbb   : > { %v1231_v43 = vadd.f32 %v1230_v25, %v1229_v23  ;;  %2020 = vpow2.f32 %v1323_v5  ;;  %v1355_v26 = vadd.f32 %v1354_v30, %v2571_v22  ;;  %v2745_v12 = vmul.f32 %v955_v49, %v955_v49  ;;  %v2936_v22 = vld [vmem:[#allocation21_spill] sm:$0xff] }
  0xbc   : > { %v1074_v40 = vsel %vm2318_vm4, %v2738_v2, 0.0  ;;  %v1239_v44 = vrot.slane %v1238_v60, 1  ;;  %v1363_v0 = vsel %vm837_vm0, %v1352_v16, 0.0  ;;  %v1259_v55 = vadd.f32 %v1258_v54, %v1257_v9 }
  0xbd   : > { %v2017_v62 = vpop.eup %2016  ;;  %2022 = vlog2.f32 %v1231_v43  ;;  %v1356_v6 = vrot.slane %v1355_v26, 4  ;;  %v1364_v19 = vadd.f32 %v1363_v0, %v2578_v14  ;;  %v1169_v61 = vmul.f32 %v1167_v51, %v2670_v52 }
  0xbe   : > { %v1142_v45 = vmul.f32 0.6931472, %v2017_v62  ;;  %v1240_v28 = vadd.f32 %v1239_v44, %v1238_v60  ;;  %v1413_v27 = vsub.f32 %v2936_v22, %v2510_v48  ;;  %v1267_v4 = vrot.slane %v1266_v17, 1 }
  0xbf   : > { %v2019_v1 = vpop.eup %2018  ;;  %v1357_v7 = vadd.f32 %v1356_v6, %v1355_v26  ;;  %v1365_v18 = vrot.slane %v1364_v19, 4  ;;  %v1414_v11 = vsub.f32 %v2937_v29, %v2515_v13  ;;  %v2766_v23 = vsub.f32 0.0, %v1074_v40 }
  0xc0   : > { %v1168_v15 = vsub.f32 %v1166_v47, %v1142_v45  ;;  %2024 = vlog2.f32 %v1240_v28  ;;  %v1326_v63 = vsel %vm837_vm0, %v2019_v1, 0.0  ;;  %v1423_v3 = vmul.f32 1.442695, %v1413_v27 }
  0xc1   : > { %v2021_v14 = vpop.eup %2020  ;;  %v1327_v53 = vadd.f32 %v1326_v63, %v2697_v36  ;;  %v1358_v10 = vrot.slane %v1357_v7, 2  ;;  %v1366_v33 = vadd.f32 %v1365_v18, %v1364_v19  ;;  %v1425_v46 = vmul.f32 1.442695, %v1414_v11 }
  0xc2   : > { %v1170_v48 = vmul.f32 %v1168_v15, %v2672_v8  ;;  %v1335_v56 = vsel %vm837_vm0, %v2021_v14, 0.0  ;;  %2026 = vpow2.f32 %v1423_v3  ;;  %v1453_v59 = vmul.f32 %v2603_v42, %v1413_v27 }
  0xc3   : > { %v2023_v2 = vpop.eup %2022  ;;  %v1328_v13 = vrot.slane %v1327_v53, 4  ;;  %v1336_v39 = vadd.f32 %v1335_v56, %v2704_v50  ;;  %v2763_v9 = vadd.f32 %v1358_v10, %v1357_v7  ;;  %v1367_v58 = vrot.slane %v1366_v33, 2 }
  0xc4   : > { %v1173_v21 = vrot.slane %v1170_v48, 7  ;;  %v1242_v49 = vmul.f32 0.6931472, %v2023_v2  ;;  %2028 = vpow2.f32 %v1425_v46  ;;  %v1454_v36 = vmul.f32 %v2608_v37, %v1414_v11 }
  0xc5   : > { %v1268_v5 = vadd.f32 %v1267_v4, %v1266_v17  ;;  %v1329_v35 = vadd.f32 %v1328_v13, %v1327_v53  ;;  %v1337_v31 = vrot.slane %v1336_v39, 4  ;;  %v1456_v25 = vsel %vm837_vm0, %v1453_v59, 0.0  ;;  %v1502_v4 = vld [vmem:[#allocation8] sm:$0x3]  ;;  %v1078_v13 = vld [vmem:[#allocation4] sm:$0x3] }
  0xc6   : > { %v2025_v41 = vpop.eup %2024  ;;  %v1174_v42 = vsel %vm786_vm1, %v1169_v61, %v1173_v21  ;;  %v1269_v16 = vsub.f32 %v1259_v55, %v1242_v49  ;;  %v1465_v50 = vsel %vm837_vm0, %v1454_v36, 0.0  ;;  %v959_v60 = vsub.f32 0.0, %v2745_v12  ;;  %v2938_v61 = vld [vmem:[#allocation24_spill] sm:$0xff] }
  0xc7   : > { %v1176_v54 = vsel %vm2318_vm4, %v1174_v42, 0.0  ;;  %v1244_v30 = vmul.f32 0.6931472, %v2025_v41  ;;  %v1330_v47 = vrot.slane %v1329_v35, 2  ;;  %v1338_v51 = vadd.f32 %v1337_v31, %v1336_v39  ;;  %v976_v39 = vld [vmem:[#allocation3] sm:$0x3] }
  0xc8   : > { %v2027_v37 = vpop.eup %2026  ;;  %v1177_v43 = vsub.f32 0.0, %v1176_v54  ;;  %v1360_v17 = vrot.slane %v2763_v9, 1  ;;  %v1368_v26 = vadd.f32 %v1367_v58, %v1366_v33  ;;  %v1271_v6 = vmul.f32 %v1269_v16, %v2670_v52  ;;  %v1180_v36 = vld [vmem:[#allocation5] sm:$0x3]  ;;  %v958_v42 = vld [vmem:[#allocation2] sm:$0x3] }
  0xc9   : > { %v1270_v40 = vsub.f32 %v1268_v5, %v1244_v30  ;;  %v1331_v44 = vadd.f32 %v1330_v47, %v1329_v35  ;;  %v1339_v0 = vrot.slane %v1338_v51, 2  ;;  %v1428_v62 = vsel %vm837_vm0, %v2027_v37, 0.0 }
  0xca   : > { %v2029_v55 = vpop.eup %2028  ;;  %v1429_v19 = vadd.f32 %v1428_v62, %v2712_v57  ;;  %v1457_v45 = vadd.f32 %v1456_v25, %v2596_v20  ;;  %v1466_v28 = vadd.f32 %v1465_v50, %v2938_v61  ;;  %v1504_v57 = vperm.slane %v1502_v4, 0 }
  0xcb   : > { %v1272_v12 = vmul.f32 %v1270_v40, %v2672_v8  ;;  %v1332_v22 = vrot.slane %v1331_v44, 1  ;;  %v1340_v27 = vadd.f32 %v1339_v0, %v1338_v51  ;;  %v1437_v1 = vsel %vm837_vm0, %v2029_v55, 0.0 }
  0xcc   : > { %v1430_v7 = vrot.slane %v1429_v19, 4  ;;  %v1438_v18 = vadd.f32 %v1437_v1, %v2723_v38  ;;  %v1458_v29 = vrot.slane %v1457_v45, 4  ;;  %v1467_v11 = vrot.slane %v1466_v28, 4 }
  0xcd   : > { %v1275_v15 = vrot.slane %v1272_v12, 7  ;;  %v1333_v63 = vadd.f32 %v1332_v22, %v1331_v44  ;;  %v1341_v3 = vrot.slane %v1340_v27, 1  ;;  %v1505_v48 = vperm.slane %v1502_v4, 1 }
  0xce   : > { %v1431_v14 = vadd.f32 %v1430_v7, %v1429_v19  ;;  %v1439_v20 = vrot.slane %v1438_v18, 4  ;;  %v1459_v53 = vadd.f32 %v1458_v29, %v1457_v45  ;;  %v1468_v10 = vadd.f32 %v1467_v11, %v1466_v28 }
  0xcf   : > { %v1276_v33 = vsel %vm786_vm1, %v1271_v6, %v1275_v15  ;;  %v1342_v46 = vadd.f32 %v1341_v3, %v1340_v27  ;;  %2030 = vlog2.f32 %v1333_v63  ;;  %v960_v56 = vmul.f32 %v959_v60, %v2742_v34 }
  0xd0   : > { %v1278_v38 = vsel %vm2318_vm4, %v1276_v33, 0.0  ;;  %v1432_v59 = vrot.slane %v1431_v14, 2  ;;  %v1440_v2 = vadd.f32 %v1439_v20, %v1438_v18  ;;  %v1460_v21 = vrot.slane %v1459_v53, 2 }
  0xd1   : > { %v1279_v58 = vsub.f32 0.0, %v1278_v38  ;;  %2032 = vlog2.f32 %v1342_v46  ;;  %v1508_v49 = vsel %vm786_vm1, %v1504_v57, 0.0  ;;  %v1369_v5 = vrot.slane %v1368_v26, 1 }
  0xd2   : > { %v1433_v35 = vadd.f32 %v1432_v59, %v1431_v14  ;;  %v1441_v31 = vrot.slane %v1440_v2, 2  ;;  %v1509_v41 = vsel %vm786_vm1, %v1505_v48, 0.0  ;;  %v1469_v34 = vrot.slane %v1468_v10, 2 }
  0xd3   : > { %v1510_v16 = vadd.f32 %v1509_v41, %v1508_v49  ;;  %v1178_v25 = vadd.f32 %v1177_v43, %v1078_v13  ;;  %v1076_v50 = vadd.f32 %v2766_v23, %v976_v39  ;;  %v1280_v47 = vadd.f32 %v1279_v58, %v1180_v36 }
  0xd4   : > { %v1434_v54 = vrot.slane %v1433_v35, 1  ;;  %v1442_v30 = vadd.f32 %v1441_v31, %v1440_v2  ;;  %v1361_v37 = vadd.f32 %v1360_v17, %v2763_v9  ;;  %v1461_v60 = vadd.f32 %v1460_v21, %v1459_v53  ;;  %v1282_v2 = vld [vmem:[#allocation6] sm:$0x3] }
  0xd5   : > { %v2031_v51 = vpop.eup %2030  ;;  %1511 = vadd.xlane.f32.xlu2 %v1510_v16  ;;  %1179 = vst.msk [vmem:[#allocation4] sm:$0x3] %vm2367_vm7, %v1178_v25  ;;  %v961_v40 = vadd.f32 %v960_v56, %v958_v42  ;;  %v1370_v0 = vadd.f32 %v1369_v5, %v1368_v26  ;;  %v1470_v43 = vadd.f32 %v1469_v34, %v1468_v10 }
  0xd6   : > { %v1344_v44 = vmul.f32 0.6931472, %v2031_v51  ;;  %v1435_v62 = vadd.f32 %v1434_v54, %v1433_v35  ;;  %v1443_v55 = vrot.slane %v1442_v30, 1  ;;  %1077 = vst.msk [vmem:[#allocation3] sm:$0x3] %vm2367_vm7, %v1076_v50  ;;  %v1462_v17 = vrot.slane %v1461_v60, 1 }
  0xd7   : > { %v2033_v23 = vpop.eup %2032  ;;  %1281 = vst.msk [vmem:[#allocation5] sm:$0x3] %vm2367_vm7, %v1280_v47  ;;  %v1471_v26 = vrot.slane %v1470_v43, 1  ;;  %v1384_v51 = vld [vmem:[#allocation7] sm:$0x3] }
  0xd8   : > { %v1346_v6 = vmul.f32 0.6931472, %v2033_v23  ;;  %v1444_v9 = vadd.f32 %v1443_v55, %v1442_v30  ;;  %2034 = vlog2.f32 %v1435_v62  ;;  %966 = vst.msk [vmem:[#allocation2] sm:$0x3] %vm2367_vm7, %v961_v40  ;;  %v1371_v19 = vsub.f32 %v1361_v37, %v1344_v44 }
  0xd9   : > { %v1463_v12 = vadd.f32 %v1462_v17, %v1461_v60  ;;  %v1472_v63 = vadd.f32 %v1471_v26, %v1470_v43 }
  0xda   : > { %v1372_v45 = vsub.f32 %v1370_v0, %v1346_v6  ;;  %2036 = vlog2.f32 %v1444_v9  ;;  %v1373_v7 = vmul.f32 %v1371_v19, %v2670_v52 }
  0xdc   : > { %v1374_v61 = vmul.f32 %v1372_v45, %v2672_v8  ;;  %v1526_v28 = vld [vmem:[#allocation4] sm:$0x3] }
  0xdd   : > { %v1528_v22 = vperm.slane %v1526_v28, 0  ;;  %v1529_v27 = vperm.slane %v1526_v28, 1  ;;  %v1514_v1 = vld [vmem:[#allocation3] sm:$0x3] }
  0xde   : > { %v2035_v4 = vpop.eup %2034  ;;  %v1377_v18 = vrot.slane %v1374_v61, 7  ;;  %v1516_v29 = vperm.slane %v1514_v1, 0  ;;  %v1517_v11 = vperm.slane %v1514_v1, 1  ;;  %v1538_v14 = vld [vmem:[#allocation5] sm:$0x3] }
  0xdf   : > { %v1446_v15 = vmul.f32 0.6931472, %v2035_v4  ;;  %v1532_v3 = vsel %vm786_vm1, %v1528_v22, 0.0  ;;  %v1533_v57 = vsel %vm786_vm1, %v1529_v27, 0.0  ;;  %v1489_v48 = vld [vmem:[#allocation2] sm:$0x3] }
  0xe0   : > { %v2037_v20 = vpop.eup %2036  ;;  %v1378_v53 = vsel %vm786_vm1, %v1373_v7, %v1377_v18  ;;  %v1534_v10 = vadd.f32 %v1533_v57, %v1532_v3  ;;  %v1520_v33 = vsel %vm786_vm1, %v1516_v29, 0.0  ;;  %v1521_v46 = vsel %vm786_vm1, %v1517_v11, 0.0 }
  0xe1   : > { %v1380_v56 = vsel %vm2318_vm4, %v1378_v53, 0.0  ;;  %v1448_v38 = vmul.f32 0.6931472, %v2037_v20  ;;  %v1522_v59 = vadd.f32 %v1521_v46, %v1520_v33  ;;  %v1540_v39 = vperm.slane %v1538_v14, 0 }
  0xe2   : > { %v1381_v13 = vsub.f32 0.0, %v1380_v56  ;;  %1535 = vadd.xlane.f32.xlu0 %v1534_v10  ;;  %v1541_v58 = vperm.slane %v1538_v14, 1  ;;  %v1491_v21 = vperm.slane %v1489_v48, 0  ;;  %v1473_v49 = vsub.f32 %v1463_v12, %v1446_v15 }
  0xe3   : > { %v1474_v36 = vsub.f32 %v1472_v63, %v1448_v38  ;;  %1523 = vadd.xlane.f32.xlu2 %v1522_v59  ;;  %v1492_v5 = vperm.slane %v1489_v48, 1  ;;  %v1544_v34 = vsel %vm786_vm1, %v1540_v39, 0.0 }
  0xe4   : > { %v1495_v35 = vsel %vm786_vm1, %v1491_v21, 0.0  ;;  %v1382_v31 = vadd.f32 %v1381_v13, %v1282_v2  ;;  %v1545_v16 = vsel %vm786_vm1, %v1541_v58, 0.0  ;;  %v1475_v50 = vmul.f32 %v1473_v49, %v2670_v52 }
  0xe5   : > { %v1476_v41 = vmul.f32 %v1474_v36, %v2672_v8  ;;  %v1496_v42 = vsel %vm786_vm1, %v1492_v5, 0.0  ;;  %v1546_v47 = vadd.f32 %v1545_v16, %v1544_v34 }
  0xe6   : > { %v1497_v25 = vadd.f32 %v1496_v42, %v1495_v35  ;;  %1383 = vst.msk [vmem:[#allocation6] sm:$0x3] %vm2367_vm7, %v1382_v31 }
  0xe7   : > { %v1479_v54 = vrot.slane %v1476_v41, 7 }
  0xe8   : > { %1498 = vadd.xlane.f32.xlu1 %v1497_v25 }
  0xe9   : > { %v1480_v30 = vsel %vm786_vm1, %v1475_v50, %v1479_v54 }
  0xea   : > { %v1482_v8 = vsel %vm2318_vm4, %v1480_v30, 0.0 }
  0xeb   : > { %v1483_v37 = vsub.f32 0.0, %v1482_v8  ;;  %1547 = vadd.xlane.f32.xlu2 %v1546_v47 }
  0xed   : > { %v1550_v60 = vld [vmem:[#allocation6] sm:$0x3]  ;;  %v1484_v40 = vadd.f32 %v1483_v37, %v1384_v51 }
  0xee   : > { %v1552_v44 = vperm.slane %v1550_v60, 0  ;;  %v1553_v0 = vperm.slane %v1550_v60, 1 }
  0xef   : > { %1485 = vst.msk [vmem:[#allocation7] sm:$0x3] %vm2367_vm7, %v1484_v40 }
  0xf0   : > { %v1556_v52 = vsel %vm786_vm1, %v1552_v44, 0.0  ;;  %v1557_v62 = vsel %vm786_vm1, %v1553_v0, 0.0 }
  0xf1   : > { %v1558_v55 = vadd.f32 %v1557_v62, %v1556_v52 }
  0xf3   : > { %1559 = vadd.xlane.f32.xlu2 %v1558_v55 }
  0xf6   : > { %v1562_v24 = vld [vmem:[#allocation7] sm:$0x3] }
  0xf7   : > { %v1564_v23 = vperm.slane %v1562_v24, 0  ;;  %v1565_v43 = vperm.slane %v1562_v24, 1 }
  0xf9   : > { %v1568_v6 = vsel %vm786_vm1, %v1564_v23, 0.0  ;;  %v1569_v9 = vsel %vm786_vm1, %v1565_v43, 0.0 }
  0xfa   : > { %v1570_v17 = vadd.f32 %v1569_v9, %v1568_v6 }
  0xfc   : > { %1571 = vadd.xlane.f32.xlu2 %v1570_v17 }
 0x148   : > { %v1512_v32 = vpop.xlane.xlu2 %1511 }
 0x149   : > { %1513 = vst.msk [vmem:[%s753_s25] sm:$0x1] %vm1500_vm12, %v1512_v32  ;;  %s744_s25 = scalar_lea.vmem %s2880_s11, %s2944_s29 }
 0x155   : > { %v1536_v19 = vpop.xlane.xlu0 %1535 }
 0x156   : > { %1537 = vst.msk [vmem:[%s741_s28] sm:$0x1] %vm1500_vm12, %v1536_v19  ;;  %v1524_v45 = vpop.xlane.xlu2 %1523  ;;  %s747_s28 = scalar_lea.vmem %s2881_s12, %s2944_s29 }
 0x157   : > { %1525 = vst.msk [vmem:[%s738_s19] sm:$0x1] %vm1500_vm12, %v1524_v45  ;;  %s750_s19 = scalar_lea.vmem %s2882_s13, %s2944_s29 }
 0x15b   : > { %v1499_v26 = vpop.xlane.xlu1 %1498 }
 0x15c   : > { %1501 = vst.msk [vmem:[%s735_s22] sm:$0x1] %vm1500_vm12, %v1499_v26 }
 0x15e   : > { %v1548_v61 = vpop.xlane.xlu2 %1547 }
 0x15f   : > { %1549 = vst.msk [vmem:[%s744_s25] sm:$0x1] %vm1500_vm12, %v1548_v61 }
 0x166   : > { %v1560_v28 = vpop.xlane.xlu2 %1559 }
 0x167   : > { %1561 = vst.msk [vmem:[%s747_s28] sm:$0x1] %vm1500_vm12, %v1560_v28 }
 0x16f   : > { %v1572_v12 = vpop.xlane.xlu2 %1571 }
 0x170   : > { %1573 = vst.msk [vmem:[%s750_s19] sm:$0x1] %vm1500_vm12, %v1572_v12 }
 0x171 PF: > { %s25_s15 = sadd.s32 1, %s2060_s15   ;;  %s2939_s29 = smov %s2056_s30 }
 0x172   : > { %p22_p5 = scmp.ge.s32.totalorder %s25_s15, 4   ;;  %s2940_s30 = smov %s2942_s16 }
 0x174   :  { %24 = sbr.rel (!%p22_p5) target bundleno = 2 (0x2), region = 180 }

</bundles_post_ra>
